<compile_context>
chip_gen: v7x
topology: tpu7x:2x2x1
jax: 0.10.0
libtpu: 0.0.40
codegen_flags: <defaults>
</compile_context>

<pallas_src>
import numpy as np
import jax
import jax.numpy as jnp
from jax import lax
from jax.experimental import pallas as pl
from jax.experimental.pallas import tpu as pltpu

NUM_IN = 32        # num_in
PLANE_MID = 16     # num_s
MIDS = 4
NUM_N = MIDS * MIDS


# ---------------------------------------------------------------------------
# helpers
# ---------------------------------------------------------------------------
def _adaptive_pool_matrix(in_size, out_size):
    """Row-stochastic matrix P (out, in) reproducing AdaptiveAvgPool1d."""
    P = np.zeros((out_size, in_size), dtype=np.float32)
    for i in range(out_size):
        s = (i * in_size) // out_size
        e = -(-((i + 1) * in_size) // out_size)  # ceil
        P[i, s:e] = 1.0 / (e - s)
    return P


def _pick_block_batch(n, hw):
    """Batch elements per grid step: fatten the lane dim (amortize per-step
    overhead, keep stores lane-dense) but keep >=2 grid steps when possible so
    both v7x TensorCores get work, and cap the per-step VMEM working set."""
    lane_budget = 4096                                  # B*hw f32 lanes / step
    ok = [b for b in range(1, n + 1)
          if n % b == 0 and (b == n or (b * hw) % 128 == 0)
          and b * hw <= lane_budget]
    if not ok:
        return n if (hw % 128 != 0) else 1
    two_step = [b for b in ok if n // b >= 2]
    return max(two_step) if two_step else max(ok)


def _pack_pixel_weights(p):
    """Stack all 1x1 convs into one (112, 2C) weight + (112, 1) bias slab."""
    c, ns = NUM_IN, PLANE_MID
    z = jnp.zeros((ns, c), jnp.float32)
    wq_bd = jnp.concatenate([jnp.concatenate([p['wq1'], z], axis=1),
                             jnp.concatenate([z, p['wq2']], axis=1)], axis=0)
    # NOTE: the original module applies conv_f1_K to BOTH f1 and f2.
    wk_bd = jnp.concatenate([jnp.concatenate([p['wk1'], z], axis=1),
                             jnp.concatenate([z, p['wk1']], axis=1)], axis=0)
    wpx = jnp.concatenate([p['wfc'], wq_bd, wk_bd, p['wout']], axis=0)   # (112, 64)
    bpx = jnp.concatenate([p['bfc'], p['bq1'], p['bq2'],
                           p['bk1'], p['bk1'], p['bout']])[:, None]      # (112, 1)
    return wpx, bpx


def _pack_gcn_weights(p):
    """Pack the per-branch GCN / extend weights into one (160, 16) slab."""
    hi = lax.Precision.HIGHEST
    # GCN: relu(W2 @ (x@W1^T + b1 - x)) = relu(W2@(x@W1^T - x) + outer(W2.sum(1), b1))
    c1 = jnp.outer(p['g1w2'].sum(axis=1), p['g1b1'])
    c2 = jnp.outer(p['g2w2'].sum(axis=1), p['g2b1'])
    # conv_f*_extend folded into conv_out:  er_i = wout_i @ we_i   (host precompute)
    er1 = jnp.matmul(p['wout'][:, :NUM_IN], p['we1'], precision=hi)
    er2 = jnp.matmul(p['wout'][:, NUM_IN:], p['we2'], precision=hi)
    return jnp.concatenate([p['g1w1'].T, p['g1w2'], c1,
                            p['g2w1'].T, p['g2w2'], c2,
                            er1, er2], axis=0)                           # (160, 16)


# ---------------------------------------------------------------------------
# Pallas kernel: one block of `batch_block` samples per grid step
# ---------------------------------------------------------------------------
def _make_tem_kernel(batch_block, hw):
    NS, NN, C = PLANE_MID, NUM_N, NUM_IN
    bf16, f32 = jnp.bfloat16, jnp.float32

    def dot_nt(a, b):      # a @ b.T   (contract last with last)
        return lax.dot_general(a, b, (((1,), (1,)), ((), ())),
                               preferred_element_type=f32)

    def dot_tn(a, b):      # a.T @ b   (contract first with first)
        return lax.dot_general(a, b, (((0,), (0,)), ((), ())),
                               preferred_element_type=f32)

    def kernel(t1_ref, t2_ref, wpx_ref, bpx_ref, wg_ref, kp_ref, out_ref):
        # cast BEFORE concatenating: the (2C, L) staging copy is bf16, not f32
        x1b = t1_ref[...].astype(bf16)                      # (C, L)
        x2b = t2_ref[...].astype(bf16)                      # (C, L)
        xcat = jnp.concatenate([x1b, x2b], axis=0)          # (2C, L) bf16

        # One fused "1x1 conv" matmul: conv_fc | f1_Q | f2_Q | f1_K(f1) |
        # f1_K(f2) | conv_out, stacked on the output (sublane) axis.
        y = jnp.dot(wpx_ref[...].astype(bf16), xcat,
                    preferred_element_type=f32) + bpx_ref[...]       # (112, L)

        tc = y[0:NS]                     # (16, L) conv_fc
        q = y[NS:3 * NS]                 # (32, L) rows 0:16 f1_Q, 16:32 f2_Q
        fk = y[3 * NS:5 * NS]            # (32, L) rows 0:16 f1_K, 16:32 f1_K(f2)
        base = y[5 * NS:5 * NS + C]      # (32, L) conv_out(f1, f2) + bout

        # channel softmax of conv_fc, keep channel 1 (the attention map);
        # divide -> EUP reciprocal + VALU multiply
        m = jnp.max(tc, axis=0, keepdims=True)
        e = jnp.exp(tc - m)
        inv_den = pl.reciprocal(jnp.sum(e, axis=0, keepdims=True), approx=True)
        att = e[1:2] * inv_den                              # (1, L) f32

        fm = fk * att                                       # (32, L) both branches

        fm_b = fm.astype(bf16)
        fk_b = fk.astype(bf16)
        q_b = q.astype(bf16)
        kp_b = kp_ref[...].astype(bf16)                     # (NN, hw)

        wg = wg_ref[...]                                    # (160, 16) packed slab
        gcn = (
            (wg[0:16].astype(bf16), wg[16:32].astype(bf16), wg[32:48],
             wg[96:128].astype(bf16)),        # branch 1: g1w1^T, g1w2, C1, wout1@we1
            (wg[48:64].astype(bf16), wg[64:80].astype(bf16), wg[80:96],
             wg[128:160].astype(bf16)),       # branch 2
        )

        # tiny pooled / projection / GCN chain, unrolled per sample in the block
        for b in range(batch_block):
            sl = slice(b * hw, (b + 1) * hw)
            fm_s = fm_b[:, sl]
            fk_s = fk_b[:, sl]
            q_s = q_b[:, sl]

            # AdaptiveAvgPool(6,6)[1:-1,1:-1] as one matmul, both branches stacked
            fv = dot_nt(fm_s, kp_b).astype(bf16)            # (32, NN)

            out_acc = base[:, sl]                           # (C, hw) f32
            for i, (gw1t, gw2, cbias, er) in enumerate(gcn):
                r = slice(i * NS, (i + 1) * NS)
                # proj = softmax_over_nodes(fV^T @ fK)      (NN, hw)
                logits = dot_tn(fv[r], fk_s[r])
                lm = jnp.max(logits, axis=0, keepdims=True)
                le = jnp.exp(logits - lm)
                inv_l = pl.reciprocal(jnp.sum(le, axis=0, keepdims=True),
                                      approx=True)
                proj = le * inv_l
                proj_b = proj.astype(bf16)

                # n_state = Q @ proj^T                      (NS, NN)
                ns = dot_nt(q_s[r], proj_b)
                # GCN: relu(W2 @ (ns @ W1^T - ns) + outer(W2.sum(1), b1))
                h = jnp.dot(ns.astype(bf16), gw1t,
                            preferred_element_type=f32) - ns
                rel = jnp.maximum(
                    jnp.dot(gw2, h.astype(bf16),
                            preferred_element_type=f32) + cbias, 0.0)
                # conv_extend folded into conv_out: (wout_i @ we_i) @ rel @ proj
                er_rel = jnp.dot(er, rel.astype(bf16), preferred_element_type=f32)
                out_acc = out_acc + jnp.dot(er_rel.astype(bf16), proj_b,
                                            preferred_element_type=f32)

            out_ref[:, sl] = out_acc

    return kernel


# ---------------------------------------------------------------------------
# wrapper
# ---------------------------------------------------------------------------
def tem_forward(T1, T2, p):
    n, c, h, w = T1.shape
    assert c == NUM_IN
    hw = h * w

    # F.upsample(T2, (h, w)), default mode='nearest', integer factor.
    # TODO(synk): for large resolutions this repeat could be folded into the
    # kernel (lane broadcast of the low-res T2 block) to cut HBM traffic 4x.
    T2u = jnp.repeat(jnp.repeat(T2, h // T2.shape[2], axis=2),
                     w // T2.shape[3], axis=3)

    # channel-major layout: channels on sublanes, batch*pixels on lanes
    x1 = jnp.transpose(T1, (1, 0, 2, 3)).reshape(c, n * hw)
    x2 = jnp.transpose(T2u, (1, 0, 2, 3)).reshape(c, n * hw)

    wpx, bpx = _pack_pixel_weights(p)
    wg = _pack_gcn_weights(p)

    # AdaptiveAvgPool2d((mids+2, mids+2)) followed by [1:-1, 1:-1] crop, as one
    # (NUM_N, hw) matrix (kron of the two cropped 1-D pooling matrices).
    Ph = _adaptive_pool_matrix(h, MIDS + 2)[1:-1]
    Pw = _adaptive_pool_matrix(w, MIDS + 2)[1:-1]
    kpool = jnp.asarray(np.kron(Ph, Pw))                    # (NUM_N, hw)

    bb = _pick_block_batch(n, hw)
    steps = n // bb
    L = bb * hw

    io_spec = pl.BlockSpec((c, L), lambda i: (0, i))
    const = lambda a: pl.BlockSpec(a.shape, lambda i: (0, 0))

    out = pl.pallas_call(
        _make_tem_kernel(bb, hw),
        out_shape=jax.ShapeDtypeStruct((c, n * hw), jnp.float32),
        grid=(steps,),
        in_specs=[io_spec, io_spec,
                  const(wpx), const(bpx), const(wg), const(kpool)],
        out_specs=io_spec,
        compiler_params=pltpu.CompilerParams(
            dimension_semantics=("parallel",)),
    )(x1, x2, wpx, bpx, wg, kpool)

    return out.reshape(c, n, h, w).transpose(1, 0, 2, 3)


# ---------------------------------------------------------------------------
# pure-JAX reference (for correctness check)
# ---------------------------------------------------------------------------
def tem_reference(T1, T2, p):
    n, c, h, w = T1.shape
    T2u = jnp.repeat(jnp.repeat(T2, h // T2.shape[2], axis=2),
                     w // T2.shape[3], axis=3)

    def conv1x1(x, W, b=None):
        y = jnp.einsum('oc,nchw->nohw', W, x)
        if b is not None:
            y = y + b[None, :, None, None]
        return y

    Tc = conv1x1(jnp.concatenate([T1, T2u], axis=1), p['wfc'], p['bfc'])
    fc_att = jax.nn.softmax(Tc, axis=1)[:, 1:2]

    Ph = jnp.asarray(_adaptive_pool_matrix(h, MIDS + 2)[1:-1])
    Pw = jnp.asarray(_adaptive_pool_matrix(w, MIDS + 2)[1:-1])

    def branch(f, wq, bq, gw1, gb1, gw2, we):
        fQ = conv1x1(f, wq, bq).reshape(n, PLANE_MID, -1)
        fk = conv1x1(f, p['wk1'], p['bk1'])
        fm = fk * fc_att
        fV = jnp.einsum('oh,nchw,pw->ncop', Ph, fm, Pw).reshape(n, PLANE_MID, -1)
        proj = jnp.einsum('ncm,nck->nmk', fV, fk.reshape(n, PLANE_MID, -1))
        proj = jax.nn.softmax(proj, axis=1)
        n_state = jnp.einsum('nck,nmk->ncm', fQ, proj)
        hh = jnp.einsum('ncm,om->nco', n_state, gw1) + gb1[None, None, :]
        hh = hh - n_state
        n_rel = jnp.maximum(jnp.einsum('oc,ncm->nom', gw2, hh), 0.0)
        state = jnp.einsum('ncm,nmk->nck', n_rel, proj).reshape(n, PLANE_MID, h, w)
        return f + conv1x1(state, we)

    f1_out = branch(T1, p['wq1'], p['bq1'], p['g1w1'], p['g1b1'], p['g1w2'], p['we1'])
    f2_out = branch(T2u, p['wq2'], p['bq2'], p['g2w1'], p['g2b1'], p['g2w2'], p['we2'])
    return conv1x1(jnp.concatenate([f1_out, f2_out], axis=1), p['wout'], p['bout'])


# ---------------------------------------------------------------------------
# deterministic parameter init (synthetic; no checkpoint)
# ---------------------------------------------------------------------------
def init_params(key):
    ks = jax.random.split(key, 24)

    def u(k, shape, fan_in):
        b = 1.0 / np.sqrt(fan_in)
        return jax.random.uniform(k, shape, jnp.float32, -b, b)

    p = {}
    p['wfc'] = u(ks[0], (PLANE_MID, 2 * NUM_IN), 2 * NUM_IN)
    p['bfc'] = u(ks[1], (PLANE_MID,), 2 * NUM_IN)
    p['wout'] = u(ks[2], (NUM_IN, 2 * NUM_IN), 2 * NUM_IN)
    p['bout'] = u(ks[3], (NUM_IN,), 2 * NUM_IN)
    p['wq1'] = u(ks[4], (PLANE_MID, NUM_IN), NUM_IN)
    p['bq1'] = u(ks[5], (PLANE_MID,), NUM_IN)
    p['wk1'] = u(ks[6], (PLANE_MID, NUM_IN), NUM_IN)
    p['bk1'] = u(ks[7], (PLANE_MID,), NUM_IN)
    p['wq2'] = u(ks[8], (PLANE_MID, NUM_IN), NUM_IN)
    p['bq2'] = u(ks[9], (PLANE_MID,), NUM_IN)
    # conv_f2_K exists in __init__ but is never used in forward (the original
    # module reuses conv_f1_K for the f2 branch); kept only for completeness.
    p['wk2'] = u(ks[10], (PLANE_MID, NUM_IN), NUM_IN)
    p['bk2'] = u(ks[11], (PLANE_MID,), NUM_IN)
    p['g1w1'] = u(ks[12], (NUM_N, NUM_N), NUM_N)
    p['g1b1'] = u(ks[13], (NUM_N,), NUM_N)
    p['g1w2'] = u(ks[14], (PLANE_MID, PLANE_MID), PLANE_MID)
    p['we1'] = u(ks[15], (NUM_IN, PLANE_MID), PLANE_MID)
    p['g2w1'] = u(ks[16], (NUM_N, NUM_N), NUM_N)
    p['g2b1'] = u(ks[17], (NUM_N,), NUM_N)
    p['g2w2'] = u(ks[18], (PLANE_MID, PLANE_MID), PLANE_MID)
    p['we2'] = u(ks[19], (NUM_IN, PLANE_MID), PLANE_MID)
    return p


if __name__ == "__main__":
    key = jax.random.PRNGKey(0)
    k1, k2, k3 = jax.random.split(key, 3)

    n, c, h, w = 2, NUM_IN, 16, 16
    T1 = jax.random.normal(k1, (n, c, h, w), jnp.float32)
    T2 = jax.random.normal(k2, (n, c, h // 2, w // 2), jnp.float32)
    params = init_params(k3)

    out = tem_forward(T1, T2, params)
    jax.block_until_ready(out)
    assert out.shape == (n, c, h, w)

    ref = tem_reference(T1, T2, params)
    # kernel uses single-pass bf16 MXU operands with f32 accumulation, EUP
    # approx reciprocals in the softmaxes, and a folded epilogue, so allow a
    # few e-3 of divergence from the XLA f32 reference
    np.testing.assert_allclose(np.asarray(out), np.asarray(ref),
                               rtol=1e-2, atol=1e-2)
    print("KERNEL_OK")
</pallas_src>

<mosaic_0001>
module attributes {stable_mosaic.version = 11 : i64} {
  func.func @kernel(%arg0: i32, %arg1: memref<32x256xf32, #tpu.memory_space<vmem>>, %arg2: memref<32x256xf32, #tpu.memory_space<vmem>>, %arg3: memref<112x64xf32, #tpu.memory_space<vmem>>, %arg4: memref<112x1xf32, #tpu.memory_space<vmem>>, %arg5: memref<160x16xf32, #tpu.memory_space<vmem>>, %arg6: memref<16x256xf32, #tpu.memory_space<vmem>>, %arg7: memref<32x256xf32, #tpu.memory_space<vmem>>) attributes {dimension_semantics = [#tpu.dimension_semantics<parallel>], iteration_bounds = array<i64: 2>, scalar_prefetch = 0 : i64, scratch_operands = 0 : i64, tpu.core_type = #tpu.core_type<tc>, window_params = [{transform_indices = @transform_0, window_bounds = array<i64: 32, 256>}, {transform_indices = @transform_1, window_bounds = array<i64: 32, 256>}, {pipeline_mode = #tpu.pipeline_mode<synchronous>, transform_indices = @transform_2, window_bounds = array<i64: 112, 64>}, {pipeline_mode = #tpu.pipeline_mode<synchronous>, transform_indices = @transform_3, window_bounds = array<i64: 112, 1>}, {pipeline_mode = #tpu.pipeline_mode<synchronous>, transform_indices = @transform_4, window_bounds = array<i64: 160, 16>}, {pipeline_mode = #tpu.pipeline_mode<synchronous>, transform_indices = @transform_5, window_bounds = array<i64: 16, 256>}, {transform_indices = @transform_6, window_bounds = array<i64: 32, 256>}]} {
    %c0 = arith.constant 0 : index
    %c0_0 = arith.constant 0 : index
    %0 = vector.load %arg1[%c0, %c0_0] : memref<32x256xf32, #tpu.memory_space<vmem>>, vector<32x256xf32>
    %1 = arith.truncf %0 : vector<32x256xf32> to vector<32x256xbf16>
    %c0_1 = arith.constant 0 : index
    %c0_2 = arith.constant 0 : index
    %2 = vector.load %arg2[%c0_1, %c0_2] : memref<32x256xf32, #tpu.memory_space<vmem>>, vector<32x256xf32>
    %3 = arith.truncf %2 : vector<32x256xf32> to vector<32x256xbf16>
    %4 = tpu.concatenate %1, %3 in 0 : vector<32x256xbf16>, vector<32x256xbf16> -> vector<64x256xbf16>
    %c0_3 = arith.constant 0 : index
    %c0_4 = arith.constant 0 : index
    %5 = vector.load %arg3[%c0_3, %c0_4] : memref<112x64xf32, #tpu.memory_space<vmem>>, vector<112x64xf32>
    %6 = arith.truncf %5 : vector<112x64xf32> to vector<112x64xbf16>
    %cst = arith.constant dense<0.000000e+00> : vector<112x256xf32>
    %7 = tpu.matmul %6, %4, %cst {dimension_numbers = #tpu.dot_dimension_numbers<[1], [0], [0], [1], [0, 0, 1, 1], [], []>} : vector<112x64xbf16>, vector<64x256xbf16>, vector<112x256xf32> -> vector<112x256xf32>
    %c0_5 = arith.constant 0 : index
    %c0_6 = arith.constant 0 : index
    %8 = vector.load %arg4[%c0_5, %c0_6] : memref<112x1xf32, #tpu.memory_space<vmem>>, vector<112x1xf32>
    %9 = vector.broadcast %8 : vector<112x1xf32> to vector<112x256xf32>
    %10 = arith.addf %7, %9 : vector<112x256xf32>
    %11 = vector.extract_strided_slice %10 {offsets = [0, 0], sizes = [16, 256], strides = [1, 1]} : vector<112x256xf32> to vector<16x256xf32>
    %12 = vector.extract_strided_slice %10 {offsets = [16, 0], sizes = [32, 256], strides = [1, 1]} : vector<112x256xf32> to vector<32x256xf32>
    %13 = vector.extract_strided_slice %10 {offsets = [48, 0], sizes = [32, 256], strides = [1, 1]} : vector<112x256xf32> to vector<32x256xf32>
    %14 = vector.extract_strided_slice %10 {offsets = [80, 0], sizes = [32, 256], strides = [1, 1]} : vector<112x256xf32> to vector<32x256xf32>
    %cst_7 = arith.constant dense<0xFF800000> : vector<256xf32>
    %15 = vector.multi_reduction <maximumf>, %11, %cst_7 [0] : vector<16x256xf32> to vector<256xf32>
    %16 = vector.shape_cast %15 : vector<256xf32> to vector<1x256xf32>
    %17 = vector.broadcast %16 : vector<1x256xf32> to vector<16x256xf32>
    %18 = arith.subf %11, %17 : vector<16x256xf32>
    %19 = math.exp %18 : vector<16x256xf32>
    %cst_8 = arith.constant dense<0.000000e+00> : vector<256xf32>
    %20 = vector.multi_reduction <add>, %19, %cst_8 [0] : vector<16x256xf32> to vector<256xf32>
    %21 = vector.shape_cast %20 : vector<256xf32> to vector<1x256xf32>
    %22 = tpu.reciprocal %21 {approx = true} : vector<1x256xf32> -> vector<1x256xf32>
    %23 = vector.extract_strided_slice %19 {offsets = [1, 0], sizes = [1, 256], strides = [1, 1]} : vector<16x256xf32> to vector<1x256xf32>
    %24 = arith.mulf %23, %22 : vector<1x256xf32>
    %25 = vector.broadcast %24 : vector<1x256xf32> to vector<32x256xf32>
    %26 = arith.mulf %13, %25 : vector<32x256xf32>
    %27 = arith.truncf %26 : vector<32x256xf32> to vector<32x256xbf16>
    %28 = arith.truncf %13 : vector<32x256xf32> to vector<32x256xbf16>
    %29 = arith.truncf %12 : vector<32x256xf32> to vector<32x256xbf16>
    %c0_9 = arith.constant 0 : index
    %c0_10 = arith.constant 0 : index
    %30 = vector.load %arg6[%c0_9, %c0_10] : memref<16x256xf32, #tpu.memory_space<vmem>>, vector<16x256xf32>
    %31 = arith.truncf %30 : vector<16x256xf32> to vector<16x256xbf16>
    %c0_11 = arith.constant 0 : index
    %c0_12 = arith.constant 0 : index
    %32 = vector.load %arg5[%c0_11, %c0_12] : memref<160x16xf32, #tpu.memory_space<vmem>>, vector<160x16xf32>
    %33 = vector.extract_strided_slice %32 {offsets = [0, 0], sizes = [16, 16], strides = [1, 1]} : vector<160x16xf32> to vector<16x16xf32>
    %34 = arith.truncf %33 : vector<16x16xf32> to vector<16x16xbf16>
    %35 = vector.extract_strided_slice %32 {offsets = [16, 0], sizes = [16, 16], strides = [1, 1]} : vector<160x16xf32> to vector<16x16xf32>
    %36 = arith.truncf %35 : vector<16x16xf32> to vector<16x16xbf16>
    %37 = vector.extract_strided_slice %32 {offsets = [32, 0], sizes = [16, 16], strides = [1, 1]} : vector<160x16xf32> to vector<16x16xf32>
    %38 = vector.extract_strided_slice %32 {offsets = [96, 0], sizes = [32, 16], strides = [1, 1]} : vector<160x16xf32> to vector<32x16xf32>
    %39 = arith.truncf %38 : vector<32x16xf32> to vector<32x16xbf16>
    %40 = vector.extract_strided_slice %32 {offsets = [48, 0], sizes = [16, 16], strides = [1, 1]} : vector<160x16xf32> to vector<16x16xf32>
    %41 = arith.truncf %40 : vector<16x16xf32> to vector<16x16xbf16>
    %42 = vector.extract_strided_slice %32 {offsets = [64, 0], sizes = [16, 16], strides = [1, 1]} : vector<160x16xf32> to vector<16x16xf32>
    %43 = arith.truncf %42 : vector<16x16xf32> to vector<16x16xbf16>
    %44 = vector.extract_strided_slice %32 {offsets = [80, 0], sizes = [16, 16], strides = [1, 1]} : vector<160x16xf32> to vector<16x16xf32>
    %45 = vector.extract_strided_slice %32 {offsets = [128, 0], sizes = [32, 16], strides = [1, 1]} : vector<160x16xf32> to vector<32x16xf32>
    %46 = arith.truncf %45 : vector<32x16xf32> to vector<32x16xbf16>
    %cst_13 = arith.constant dense<0.000000e+00> : vector<32x16xf32>
    %47 = tpu.matmul %27, %31, %cst_13 {dimension_numbers = #tpu.dot_dimension_numbers<[1], [1], [0], [0], [0, 0, 1, 0], [], []>} : vector<32x256xbf16>, vector<16x256xbf16>, vector<32x16xf32> -> vector<32x16xf32>
    %48 = arith.truncf %47 : vector<32x16xf32> to vector<32x16xbf16>
    %49 = vector.extract_strided_slice %48 {offsets = [0, 0], sizes = [16, 16], strides = [1, 1]} : vector<32x16xbf16> to vector<16x16xbf16>
    %50 = vector.extract_strided_slice %28 {offsets = [0, 0], sizes = [16, 256], strides = [1, 1]} : vector<32x256xbf16> to vector<16x256xbf16>
    %cst_14 = arith.constant dense<0.000000e+00> : vector<16x256xf32>
    %51 = tpu.matmul %49, %50, %cst_14 {dimension_numbers = #tpu.dot_dimension_numbers<[0], [0], [1], [1], [0, 1, 1, 1], [], []>} : vector<16x16xbf16>, vector<16x256xbf16>, vector<16x256xf32> -> vector<16x256xf32>
    %cst_15 = arith.constant dense<0xFF800000> : vector<256xf32>
    %52 = vector.multi_reduction <maximumf>, %51, %cst_15 [0] : vector<16x256xf32> to vector<256xf32>
    %53 = vector.shape_cast %52 : vector<256xf32> to vector<1x256xf32>
    %54 = vector.broadcast %53 : vector<1x256xf32> to vector<16x256xf32>
    %55 = arith.subf %51, %54 : vector<16x256xf32>
    %56 = math.exp %55 : vector<16x256xf32>
    %cst_16 = arith.constant dense<0.000000e+00> : vector<256xf32>
    %57 = vector.multi_reduction <add>, %56, %cst_16 [0] : vector<16x256xf32> to vector<256xf32>
    %58 = vector.shape_cast %57 : vector<256xf32> to vector<1x256xf32>
    %59 = tpu.reciprocal %58 {approx = true} : vector<1x256xf32> -> vector<1x256xf32>
    %60 = vector.broadcast %59 : vector<1x256xf32> to vector<16x256xf32>
    %61 = arith.mulf %56, %60 : vector<16x256xf32>
    %62 = arith.truncf %61 : vector<16x256xf32> to vector<16x256xbf16>
    %63 = vector.extract_strided_slice %29 {offsets = [0, 0], sizes = [16, 256], strides = [1, 1]} : vector<32x256xbf16> to vector<16x256xbf16>
    %cst_17 = arith.constant dense<0.000000e+00> : vector<16x16xf32>
    %64 = tpu.matmul %63, %62, %cst_17 {dimension_numbers = #tpu.dot_dimension_numbers<[1], [1], [0], [0], [0, 0, 1, 0], [], []>} : vector<16x256xbf16>, vector<16x256xbf16>, vector<16x16xf32> -> vector<16x16xf32>
    %65 = arith.truncf %64 : vector<16x16xf32> to vector<16x16xbf16>
    %cst_18 = arith.constant dense<0.000000e+00> : vector<16x16xf32>
    %66 = tpu.matmul %65, %34, %cst_18 {dimension_numbers = #tpu.dot_dimension_numbers<[1], [0], [0], [1], [0, 0, 1, 1], [], []>} : vector<16x16xbf16>, vector<16x16xbf16>, vector<16x16xf32> -> vector<16x16xf32>
    %67 = arith.subf %66, %64 : vector<16x16xf32>
    %68 = arith.truncf %67 : vector<16x16xf32> to vector<16x16xbf16>
    %cst_19 = arith.constant dense<0.000000e+00> : vector<16x16xf32>
    %69 = tpu.matmul %36, %68, %cst_19 {dimension_numbers = #tpu.dot_dimension_numbers<[1], [0], [0], [1], [0, 0, 1, 1], [], []>} : vector<16x16xbf16>, vector<16x16xbf16>, vector<16x16xf32> -> vector<16x16xf32>
    %70 = arith.addf %69, %37 : vector<16x16xf32>
    %cst_20 = arith.constant 0.000000e+00 : f32
    %71 = vector.broadcast %cst_20 : f32 to vector<16x16xf32>
    %72 = arith.maximumf %70, %71 : vector<16x16xf32>
    %73 = arith.truncf %72 : vector<16x16xf32> to vector<16x16xbf16>
    %cst_21 = arith.constant dense<0.000000e+00> : vector<32x16xf32>
    %74 = tpu.matmul %39, %73, %cst_21 {dimension_numbers = #tpu.dot_dimension_numbers<[1], [0], [0], [1], [0, 0, 1, 1], [], []>} : vector<32x16xbf16>, vector<16x16xbf16>, vector<32x16xf32> -> vector<32x16xf32>
    %75 = arith.truncf %74 : vector<32x16xf32> to vector<32x16xbf16>
    %cst_22 = arith.constant dense<0.000000e+00> : vector<32x256xf32>
    %76 = tpu.matmul %75, %62, %cst_22 {dimension_numbers = #tpu.dot_dimension_numbers<[1], [0], [0], [1], [0, 0, 1, 1], [], []>} : vector<32x16xbf16>, vector<16x256xbf16>, vector<32x256xf32> -> vector<32x256xf32>
    %77 = arith.addf %14, %76 : vector<32x256xf32>
    %78 = vector.extract_strided_slice %48 {offsets = [16, 0], sizes = [16, 16], strides = [1, 1]} : vector<32x16xbf16> to vector<16x16xbf16>
    %79 = vector.extract_strided_slice %28 {offsets = [16, 0], sizes = [16, 256], strides = [1, 1]} : vector<32x256xbf16> to vector<16x256xbf16>
    %cst_23 = arith.constant dense<0.000000e+00> : vector<16x256xf32>
    %80 = tpu.matmul %78, %79, %cst_23 {dimension_numbers = #tpu.dot_dimension_numbers<[0], [0], [1], [1], [0, 1, 1, 1], [], []>} : vector<16x16xbf16>, vector<16x256xbf16>, vector<16x256xf32> -> vector<16x256xf32>
    %cst_24 = arith.constant dense<0xFF800000> : vector<256xf32>
    %81 = vector.multi_reduction <maximumf>, %80, %cst_24 [0] : vector<16x256xf32> to vector<256xf32>
    %82 = vector.shape_cast %81 : vector<256xf32> to vector<1x256xf32>
    %83 = vector.broadcast %82 : vector<1x256xf32> to vector<16x256xf32>
    %84 = arith.subf %80, %83 : vector<16x256xf32>
    %85 = math.exp %84 : vector<16x256xf32>
    %cst_25 = arith.constant dense<0.000000e+00> : vector<256xf32>
    %86 = vector.multi_reduction <add>, %85, %cst_25 [0] : vector<16x256xf32> to vector<256xf32>
    %87 = vector.shape_cast %86 : vector<256xf32> to vector<1x256xf32>
    %88 = tpu.reciprocal %87 {approx = true} : vector<1x256xf32> -> vector<1x256xf32>
    %89 = vector.broadcast %88 : vector<1x256xf32> to vector<16x256xf32>
    %90 = arith.mulf %85, %89 : vector<16x256xf32>
    %91 = arith.truncf %90 : vector<16x256xf32> to vector<16x256xbf16>
    %92 = vector.extract_strided_slice %29 {offsets = [16, 0], sizes = [16, 256], strides = [1, 1]} : vector<32x256xbf16> to vector<16x256xbf16>
    %cst_26 = arith.constant dense<0.000000e+00> : vector<16x16xf32>
    %93 = tpu.matmul %92, %91, %cst_26 {dimension_numbers = #tpu.dot_dimension_numbers<[1], [1], [0], [0], [0, 0, 1, 0], [], []>} : vector<16x256xbf16>, vector<16x256xbf16>, vector<16x16xf32> -> vector<16x16xf32>
    %94 = arith.truncf %93 : vector<16x16xf32> to vector<16x16xbf16>
    %cst_27 = arith.constant dense<0.000000e+00> : vector<16x16xf32>
    %95 = tpu.matmul %94, %41, %cst_27 {dimension_numbers = #tpu.dot_dimension_numbers<[1], [0], [0], [1], [0, 0, 1, 1], [], []>} : vector<16x16xbf16>, vector<16x16xbf16>, vector<16x16xf32> -> vector<16x16xf32>
    %96 = arith.subf %95, %93 : vector<16x16xf32>
    %97 = arith.truncf %96 : vector<16x16xf32> to vector<16x16xbf16>
    %cst_28 = arith.constant dense<0.000000e+00> : vector<16x16xf32>
    %98 = tpu.matmul %43, %97, %cst_28 {dimension_numbers = #tpu.dot_dimension_numbers<[1], [0], [0], [1], [0, 0, 1, 1], [], []>} : vector<16x16xbf16>, vector<16x16xbf16>, vector<16x16xf32> -> vector<16x16xf32>
    %99 = arith.addf %98, %44 : vector<16x16xf32>
    %cst_29 = arith.constant 0.000000e+00 : f32
    %100 = vector.broadcast %cst_29 : f32 to vector<16x16xf32>
    %101 = arith.maximumf %99, %100 : vector<16x16xf32>
    %102 = arith.truncf %101 : vector<16x16xf32> to vector<16x16xbf16>
    %cst_30 = arith.constant dense<0.000000e+00> : vector<32x16xf32>
    %103 = tpu.matmul %46, %102, %cst_30 {dimension_numbers = #tpu.dot_dimension_numbers<[1], [0], [0], [1], [0, 0, 1, 1], [], []>} : vector<32x16xbf16>, vector<16x16xbf16>, vector<32x16xf32> -> vector<32x16xf32>
    %104 = arith.truncf %103 : vector<32x16xf32> to vector<32x16xbf16>
    %cst_31 = arith.constant dense<0.000000e+00> : vector<32x256xf32>
    %105 = tpu.matmul %104, %91, %cst_31 {dimension_numbers = #tpu.dot_dimension_numbers<[1], [0], [0], [1], [0, 0, 1, 1], [], []>} : vector<32x16xbf16>, vector<16x256xbf16>, vector<32x256xf32> -> vector<32x256xf32>
    %106 = arith.addf %77, %105 : vector<32x256xf32>
    %c0_32 = arith.constant 0 : index
    %c0_33 = arith.constant 0 : index
    %107 = vector.load %arg7[%c0_32, %c0_33] : memref<32x256xf32, #tpu.memory_space<vmem>>, vector<32x256xf32>
    tpu.vector_store %arg7[%c0_32, %c0_33], %106 {strides = array<i32>} : memref<32x256xf32, #tpu.memory_space<vmem>>, vector<32x256xf32>,
    return
  }
  func.func @transform_0(%arg0: i32) -> (i32, i32) {
    %c0_i32 = arith.constant 0 : i32
    %c0_i32_0 = arith.constant 0 : i32
    return %c0_i32, %arg0 : i32, i32
  }
  func.func @transform_1(%arg0: i32) -> (i32, i32) {
    %c0_i32 = arith.constant 0 : i32
    %c0_i32_0 = arith.constant 0 : i32
    return %c0_i32, %arg0 : i32, i32
  }
  func.func @transform_2(%arg0: i32) -> (i32, i32) {
    %c0_i32 = arith.constant 0 : i32
    %c0_i32_0 = arith.constant 0 : i32
    %c0_i32_1 = arith.constant 0 : i32
    return %c0_i32, %c0_i32_0 : i32, i32
  }
  func.func @transform_3(%arg0: i32) -> (i32, i32) {
    %c0_i32 = arith.constant 0 : i32
    %c0_i32_0 = arith.constant 0 : i32
    %c0_i32_1 = arith.constant 0 : i32
    return %c0_i32, %c0_i32_0 : i32, i32
  }
  func.func @transform_4(%arg0: i32) -> (i32, i32) {
    %c0_i32 = arith.constant 0 : i32
    %c0_i32_0 = arith.constant 0 : i32
    %c0_i32_1 = arith.constant 0 : i32
    return %c0_i32, %c0_i32_0 : i32, i32
  }
  func.func @transform_5(%arg0: i32) -> (i32, i32) {
    %c0_i32 = arith.constant 0 : i32
    %c0_i32_0 = arith.constant 0 : i32
    %c0_i32_1 = arith.constant 0 : i32
    return %c0_i32, %c0_i32_0 : i32, i32
  }
  func.func @transform_6(%arg0: i32) -> (i32, i32) {
    %c0_i32 = arith.constant 0 : i32
    %c0_i32_0 = arith.constant 0 : i32
    return %c0_i32, %arg0 : i32, i32
  }
}

</mosaic_0001>

<bundles_post_ra>
// kernel: tpu_custom_call.1
= control target key start
LH: loop header
LB: loop body
LE: loop exit
PB: predicated region body
PF: predicated region fallthrough
CT: control target
= control target key end

     0   :  { %11 = vsyncpa [#allocation5], 0  ;;  %s2345_s0 = inlined_call_operand.vmem [shape: f32[32,512], index: 0, kind: input, shape index: {}]   ;;  %s2346_s1 = inlined_call_operand.vmem [shape: f32[32,512], index: 1, kind: input, shape index: {}]   ;;  %s2347_s2 = inlined_call_operand.vmem [shape: f32[112,64], index: 2, kind: input, shape index: {}]   ;;  %s2348_s3 = inlined_call_operand.vmem [shape: f32[112,1], index: 3, kind: input, shape index: {}]   ;;  %s2349_s4 = inlined_call_operand.vmem [shape: f32[160,16], index: 4, kind: input, shape index: {}]   ;;  %s2350_s5 = inlined_call_operand.vmem [shape: f32[16,256], index: 5, kind: input, shape index: {}]   ;;  %s2351_s6 = inlined_call_operand.hbm [shape: f32[32,512], index: 6, kind: output, shape index: {}]  }
   0x1   :  { %13 = vsyncpa [#allocation5 + $0x1], 0  ;;  %s1909_s21 = smov 0   ;;  %s1911_s22 = smov 0  }
   0x2   :  { %s1913_s23 = smov 0   ;;  %s1915_s24 = smov 0  }
   0x3 LB: > { %s1601_s25 = sadd.s32 4294967295, %s1865_s24   ;;  %s1602_s26 = sadd.s32 4294967294, %s1865_s24   ;;  %s1865_s24 = sphi %s1915_s24, %s2358_s24   ;;  %s1861_s23 = sphi %s1913_s23, %s2357_s23   ;;  %s1857_s22 = sphi %s1911_s22, %s2356_s22   ;;  %s1853_s21 = sphi %s1909_s21, %s2355_s21  }
   0x4   : > { %s1932_s27 = sadd.s32 1, %s1865_s24   ;;  %s26_s28 = sadd.s32 1, %s1861_s23 }
   0x5   : > { %s23_s29 = ssub.s32 %s1865_s24, %s1932_s27  ;;  %p33_p0 = scmp.ne.s32.totalorder %s1861_s23, %s1857_s22 }
   0x6   : > { %p24_p1 = scmp.eq.s32.totalorder %s23_s29, 0  ;;  %p34_p2 = scmp.eq.s32.totalorder %s1865_s24, 0 }
   0x7   : > { %p173_p3 = scmp.eq.s32.totalorder %s1601_s25, 1  ;;  %p178_p4 = scmp.ne.s32.totalorder %s1857_s22, %s1853_s21 }
   0x8   : > { %s1945_s30 = scalar_select %p24_p1, %s1861_s23, %s26_s28  }
   0x9   : > { %p1947_p5 = por %p34_p2, %p33_p0  ;;  %p1951_p6 = por %p173_p3, %p33_p0 }
   0xa   : > { %p179_p7 = scmp.eq.s32.totalorder %s1602_s26, 1  ;;  %p1604_p9 = scmp.ge.s32.totalorder %s1865_s24, 2 }
   0xc   : > { %p1955_p8 = por %p179_p7, %p178_p4  ;;  %207 = sbr.rel (%p1604_p9) target bundleno = 35 (0x23), region = 32 }
  0x13   : > { %210 = sbr.rel (!%p1947_p5) target bundleno = 27 (0x1b), region = 36  ;;  %s212_s10 = sand.u32 (%p1947_p5), 1, %s1861_s23  }
  0x14   : > { %s1641_s11 = sshll.u32 (%p1947_p5), %s1865_s24, 4  ;;  %s1605_s12 = sshll.u32 (%p1947_p5), %s212_s10, 6 }
  0x15   : > { %s217_s15 = scalar_lea.vmem (%p1947_p5), %s2345_s0, %s1641_s11  ;;  %s214_s16 = scalar_lea.vmem (%p1947_p5), [#allocation2], %s1605_s12 }
  0x16   : > { %v230_v0 = vld [vmem:[%s217_s15] sm:$0xff] (%p1947_p5)  ;;  %v232_v1 = vld [vmem:[%s217_s15 + $0x8] sm:$0xff] (%p1947_p5) }
  0x17   : > { %v234_v2 = vld [vmem:[%s217_s15 + $0x20] sm:$0xff] (%p1947_p5)  ;;  %231 = vst [vmem:[%s214_s16] sm:$0xff] (%p1947_p5), %v230_v0  ;;  %233 = vst [vmem:[%s214_s16 + $0x8] sm:$0xff] (%p1947_p5), %v232_v1  ;;  %v236_v3 = vld [vmem:[%s217_s15 + $0x28] sm:$0xff] (%p1947_p5) }
  0x18   : > { %235 = vst [vmem:[%s214_s16 + $0x10] sm:$0xff] (%p1947_p5), %v234_v2  ;;  %v238_v4 = vld [vmem:[%s217_s15 + $0x40] sm:$0xff] (%p1947_p5)  ;;  %v240_v5 = vld [vmem:[%s217_s15 + $0x48] sm:$0xff] (%p1947_p5)  ;;  %237 = vst [vmem:[%s214_s16 + $0x18] sm:$0xff] (%p1947_p5), %v236_v3 }
  0x19   : > { %239 = vst [vmem:[%s214_s16 + $0x20] sm:$0xff] (%p1947_p5), %v238_v4  ;;  %241 = vst [vmem:[%s214_s16 + $0x28] sm:$0xff] (%p1947_p5), %v240_v5  ;;  %v242_v6 = vld [vmem:[%s217_s15 + $0x60] sm:$0xff] (%p1947_p5)  ;;  %v244_v7 = vld [vmem:[%s217_s15 + $0x68] sm:$0xff] (%p1947_p5) }
  0x1a   : > { %243 = vst [vmem:[%s214_s16 + $0x30] sm:$0xff] %v242_v6  ;;  %245 = vst [vmem:[%s214_s16 + $0x38] sm:$0xff] %v244_v7 }
  0x1b PF: > { %251 = sbr.rel (!%p1947_p5) target bundleno = 35 (0x23), region = 59  ;;  %s253_s17 = sand.u32 (%p1947_p5), 1, %s1861_s23  }
  0x1c   : > { %s1642_s18 = sshll.u32 (%p1947_p5), %s1865_s24, 4  ;;  %s1608_s19 = sshll.u32 (%p1947_p5), %s253_s17, 6 }
  0x1d   : > { %s258_s28 = scalar_lea.vmem (%p1947_p5), %s2346_s1, %s1642_s18  ;;  %s255_s29 = scalar_lea.vmem (%p1947_p5), [#allocation3], %s1608_s19 }
  0x1e   : > { %v271_v8 = vld [vmem:[%s258_s28] sm:$0xff] (%p1947_p5)  ;;  %v273_v9 = vld [vmem:[%s258_s28 + $0x8] sm:$0xff] (%p1947_p5) }
  0x1f   : > { %v275_v10 = vld [vmem:[%s258_s28 + $0x20] sm:$0xff] (%p1947_p5)  ;;  %272 = vst [vmem:[%s255_s29] sm:$0xff] (%p1947_p5), %v271_v8  ;;  %274 = vst [vmem:[%s255_s29 + $0x8] sm:$0xff] (%p1947_p5), %v273_v9  ;;  %v277_v11 = vld [vmem:[%s258_s28 + $0x28] sm:$0xff] (%p1947_p5) }
  0x20   : > { %276 = vst [vmem:[%s255_s29 + $0x10] sm:$0xff] (%p1947_p5), %v275_v10  ;;  %v279_v12 = vld [vmem:[%s258_s28 + $0x40] sm:$0xff] (%p1947_p5)  ;;  %v281_v13 = vld [vmem:[%s258_s28 + $0x48] sm:$0xff] (%p1947_p5)  ;;  %278 = vst [vmem:[%s255_s29 + $0x18] sm:$0xff] (%p1947_p5), %v277_v11 }
  0x21   : > { %280 = vst [vmem:[%s255_s29 + $0x20] sm:$0xff] (%p1947_p5), %v279_v12  ;;  %282 = vst [vmem:[%s255_s29 + $0x28] sm:$0xff] (%p1947_p5), %v281_v13  ;;  %v283_v14 = vld [vmem:[%s258_s28 + $0x60] sm:$0xff] (%p1947_p5)  ;;  %v285_v15 = vld [vmem:[%s258_s28 + $0x68] sm:$0xff] (%p1947_p5) }
  0x22   : > { %284 = vst [vmem:[%s255_s29 + $0x30] sm:$0xff] %v283_v14  ;;  %286 = vst [vmem:[%s255_s29 + $0x38] sm:$0xff] %v285_v15 }
  0x23 PF: > { %p1611_p10 = scmp.ge.s32.totalorder %s1865_s24, 1  ;;  %p291_p11 = scmp.lt.s32.totalorder %s1865_s24, 3 }
  0x25   : > { %p292_p12 = pnand %p1611_p10, %p291_p11 }
  0x26   : > { %s298_s7 = sand.u32 (!%p292_p12), 1, %s1857_s22   ;;  %v1867_v16 = vmov (!%p292_p12), 0   ;;  %v387_v34 = vld [vmem:[%s2348_s3] sm:$0xff] (!%p292_p12)  ;;  %v393_v37 = vld [vmem:[%s2348_s3 + $0x30] sm:$0xff] (!%p292_p12)  ;;  %v388_v38 = vld [vmem:[%s2348_s3 + $0x8] sm:$0xff] (!%p292_p12)  ;;  %vm471_vm0 = vcmask (!%p292_p12), 523264  }
  0x27   : > { %295 = sbr.rel (%p292_p12) target bundleno = 3231 (0xc9f), region = 82  ;;  %s1981_s10 = sshll.u32 (!%p292_p12), %s298_s7, 6  ;;  %525 = vmatprep.mubr.bf16.mxu0 (!%p292_p12), %v1867_v16  ;;  %1765 = vset.pattern.permute.xlu0 (!%p292_p12), %v1867_v16  ;;  %v394_v40 = vld [vmem:[%s2348_s3 + $0x38] sm:$0xff] (!%p292_p12)  ;;  %v395_v44 = vld [vmem:[%s2348_s3 + $0x40] sm:$0xff] (!%p292_p12)  ;;  %v367_v47 = vld [vmem:[%s2347_s2 + $0x8] sm:$0xff] (!%p292_p12)  ;;  %vm769_vm1 = vcmask (!%p292_p12), 130048  }
  0x28   : > { %1766 = vset.pattern.permute.xlu1 (!%p292_p12), %v1867_v16  ;;  %s300_s11 = scalar_lea.vmem (!%p292_p12), [#allocation2], %s1981_s10  ;;  %s307_s12 = scalar_lea.vmem (!%p292_p12), [#allocation3], %s1981_s10  ;;  %403 = vperm.xlu0 (!%p292_p12), %1765, %v387_v34   ;;  %v366_v46 = vld [vmem:[%s2347_s2] sm:$0xff] (!%p292_p12)  ;;  %v396_v48 = vld [vmem:[%s2348_s3 + $0x48] sm:$0xff] (!%p292_p12)  ;;  %v389_v50 = vld [vmem:[%s2348_s3 + $0x10] sm:$0xff] (!%p292_p12)  ;;  %vm1869_vm2 = vmmov (!%p292_p12), 0  }
  0x29   : > { %v343_v17 = vld [vmem:[%s300_s11 + $0x8] sm:$0xff] (!%p292_p12)  ;;  %v345_v18 = vld [vmem:[%s300_s11 + $0x18] sm:$0xff] (!%p292_p12)  ;;  %v342_v19 = vld [vmem:[%s300_s11] sm:$0xff] (!%p292_p12)  ;;  %433 = vperm.xlu1 (!%p292_p12), %1766, %v393_v37   ;;  %v380_v49 = vpack.c.bf16 (!%p292_p12), %v367_v47, %v366_v46  ;;  %s337_s14 = scalar_lea.vmem (!%p292_p12), [#allocation4], %s1981_s10  ;;  %s1643_s16 = sshll.u32 (!%p292_p12), %s1601_s25, 8 }
  0x2a   : > { %v351_v20 = vpack.c.bf16 (!%p292_p12), %v345_v18, %v343_v17  ;;  %v344_v21 = vld [vmem:[%s300_s11 + $0x10] sm:$0xff] (!%p292_p12)  ;;  %v347_v22 = vld [vmem:[%s300_s11 + $0x28] sm:$0xff] (!%p292_p12)  ;;  %v349_v23 = vld [vmem:[%s300_s11 + $0x38] sm:$0xff] (!%p292_p12)  ;;  %s1516_s15 = sshll.u32 (!%p292_p12), %s337_s14, 4  ;;  %s2298_s25 = scalar_lea.hbm (!%p292_p12), %s2351_s6, %s1643_s16  ;;  %s2291_s15 = int_to_ptr.vmem [resolvable:$true] %s1516_s15 }
  0x2b   : > { %v350_v24 = vpack.c.bf16 (!%p292_p12), %v344_v21, %v342_v19  ;;  %v353_v25 = vpack.c.bf16 (!%p292_p12), %v349_v23, %v347_v22  ;;  %v346_v26 = vld [vmem:[%s300_s11 + $0x20] sm:$0xff] (!%p292_p12)  ;;  %v348_v27 = vld [vmem:[%s300_s11 + $0x30] sm:$0xff] (!%p292_p12)  ;;  %v355_v28 = vld [vmem:[%s307_s12 + $0x8] sm:$0xff] (!%p292_p12)  ;;  %s2303_s17 = scalar_lea.sflag (!%p292_p12), [#allocation5], %s298_s7  ;;  %s1803_s18 = scalar_lea.vmem (!%p292_p12), %s2291_s15, 1024 }
  0x2c   : > { %493 = vmatprep.subr.bf16.mxu0 (!%p292_p12), %v351_v20  ;;  %v357_v29 = vld [vmem:[%s307_s12 + $0x18] sm:$0xff] (!%p292_p12)  ;;  %v352_v30 = vpack.c.bf16 (!%p292_p12), %v348_v27, %v346_v26  ;;  %v354_v32 = vld [vmem:[%s307_s12] sm:$0xff] (!%p292_p12)  ;;  %v356_v33 = vld [vmem:[%s307_s12 + $0x10] sm:$0xff] (!%p292_p12)  ;;  %408 = vperm.xlu0 (!%p292_p12), %1765, %v388_v38   ;;  %p1804_p13 = scmp.ne.s32.totalorder (!%p292_p12), %s2291_s15, %s1803_s18  ;;  %s1870_s19 = smov (!%p292_p12), [#allocation4]  }
  0x2d   : > { %494 = vmatpush1.bf16.msra.mxu0 (!%p292_p12), %v350_v24  ;;  %v363_v31 = vpack.c.bf16 (!%p292_p12), %v357_v29, %v355_v28  ;;  %v359_v35 = vld [vmem:[%s307_s12 + $0x28] sm:$0xff] (!%p292_p12)  ;;  %v361_v36 = vld [vmem:[%s307_s12 + $0x38] sm:$0xff] (!%p292_p12)  ;;  %v362_v39 = vpack.c.bf16 (!%p292_p12), %v356_v33, %v354_v32  ;;  %v358_v42 = vld [vmem:[%s307_s12 + $0x20] sm:$0xff] (!%p292_p12)  ;;  %438 = vperm.xlu1 (!%p292_p12), %1766, %v394_v40   ;;  %s1807_s20 = sshll.u32 (!%p292_p12), %s1870_s19, 4  ;;  %s1808_s20 = int_to_ptr.vmem [resolvable:$false] %s1807_s20 }
  0x2e   : > { %495 = vmatprep.subr.bf16.mxu0 %v353_v25  ;;  %v365_v41 = vpack.c.bf16 %v361_v36, %v359_v35  ;;  %v360_v43 = vld [vmem:[%s307_s12 + $0x30] sm:$0xff]  ;;  %v369_v52 = vld [vmem:[%s2347_s2 + $0x18] sm:$0xff]  ;;  %v370_v55 = vld [vmem:[%s2347_s2 + $0x20] sm:$0xff]  ;;  %p1805_p0 = pnand %p1804_p13, %p1951_p6  ;;  %s1809_s26 = scalar_lea.vmem %s1808_s20, 2048 }
  0x2f   : > { %v364_v45 = vpack.c.bf16 %v360_v43, %v358_v42  ;;  %v368_v51 = vld [vmem:[%s2347_s2 + $0x10] sm:$0xff]  ;;  %v390_v53 = vld [vmem:[%s2348_s3 + $0x18] sm:$0xff]  ;;  %v371_v56 = vld [vmem:[%s2347_s2 + $0x28] sm:$0xff]  ;;  %p1810_p2 = scmp.lt.s32.totalorder %s2291_s15, %s1808_s20  ;;  %p1811_p3 = scmp.lt.s32.totalorder %s1809_s26, %s1803_s18 }
  0x30   : > { %443 = vperm.xlu0 %1765, %v395_v44   ;;  %v381_v54 = vpack.c.bf16 %v369_v52, %v368_v51  ;;  %v382_v57 = vpack.c.bf16 %v371_v56, %v370_v55  ;;  %v372_v58 = vld [vmem:[%s2347_s2 + $0x30] sm:$0xff]  ;;  %v373_v59 = vld [vmem:[%s2347_s2 + $0x38] sm:$0xff]  ;;  %v374_v61 = vld [vmem:[%s2347_s2 + $0x40] sm:$0xff]  ;;  %p1806_p1 = pneg %p1805_p0 }
  0x31   : > { %496 = vmatpush1.bf16.msra.mxu0 %v352_v30  ;;  %448 = vperm.xlu1 %1766, %v396_v48   ;;  %v383_v60 = vpack.c.bf16 %v373_v59, %v372_v58  ;;  %v375_v62 = vld [vmem:[%s2347_s2 + $0x48] sm:$0xff]  ;;  %v671_v1 = vld [vmem:[%s2350_s5 + $0x18] sm:$0xff]  ;;  %v668_v3 = vld [vmem:[%s2350_s5] sm:$0xff]  ;;  %p1812_p4 = por %p1811_p3, %p1810_p2 }
  0x32   : > { %497 = vmatprep.subr.bf16.mxu0 %v363_v31  ;;  %v384_v63 = vpack.c.bf16 %v375_v62, %v374_v61  ;;  %v669_v0 = vld [vmem:[%s2350_s5 + $0x8] sm:$0xff]  ;;  %v670_v4 = vld [vmem:[%s2350_s5 + $0x10] sm:$0xff]  ;;  %v377_v7 = vld [vmem:[%s2347_s2 + $0x58] sm:$0xff] }
  0x33   : > { %v673_v2 = vpack.c.bf16 %v671_v1, %v669_v0  ;;  %v672_v5 = vpack.c.bf16 %v670_v4, %v668_v3  ;;  %v376_v6 = vld [vmem:[%s2347_s2 + $0x50] sm:$0xff]  ;;  %v378_v9 = vld [vmem:[%s2347_s2 + $0x60] sm:$0xff]  ;;  %v379_v10 = vld [vmem:[%s2347_s2 + $0x68] sm:$0xff]  ;;  %p1813_p5 = pnand %p1812_p4, %p1806_p1 }
  0x34   : > { %v385_v8 = vpack.c.bf16 %v377_v7, %v376_v6  ;;  %v386_v11 = vpack.c.bf16 %v379_v10, %v378_v9 }
  0x35   : > { %498 = vmatpush1.bf16.msra.mxu0 %v362_v39  ;;  %413 = vperm.xlu1 %1766, %v389_v50  }
  0x36   : > { %499 = vmatprep.subr.bf16.mxu0 %v365_v41  ;;  %702 = vmatprep.subr.bf16.mxu1 %v673_v2 }
  0x37   : > { %703 = vmatpush1.bf16.xpose.msra.mxu1 %v672_v5 }
  0x39   : > { %500 = vmatpush1.bf16.msra.mxu0 %v364_v45  ;;  %418 = vperm.xlu1 %1766, %v390_v53  }
  0x3c   : > { %1615 = vmatmul.mubr.msk.bf16.vlgmr.msra.gmra.mrb[0].mxu0 %vm471_vm0, %v380_v49 }
  0x3d   : > { %535 = vmatprep.mubr.bf16.mxu0 %v1867_v16 }
  0x44   : > { %1616 = vmatmul.mubr.msk.bf16.gmra.mrb[4].mxu0 %vm471_vm0, %v381_v54 }
  0x45   : > { %545 = vmatprep.mubr.bf16.mxu0 %v1867_v16 }
  0x4c   : > { %1617 = vmatmul.mubr.msk.bf16.gmra.mrb[8].mxu0 %vm471_vm0, %v382_v57 }
  0x4d   : > { %555 = vmatprep.mubr.bf16.mxu0 %v1867_v16 }
  0x54   : > { %1618 = vmatmul.mubr.msk.bf16.gmra.mrb[12].mxu0 %vm471_vm0, %v383_v60 }
  0x55   : > { %565 = vmatprep.mubr.bf16.mxu0 %v1867_v16 }
  0x5c   : > { %1619 = vmatmul.mubr.msk.bf16.gmra.mrb[16].mxu0 %vm471_vm0, %v384_v63 }
  0x5d   : > { %575 = vmatprep.mubr.bf16.mxu0 %v1867_v16 }
  0x64   : > { %1620 = vmatmul.mubr.msk.bf16.gmra.mrb[20].mxu0 %vm471_vm0, %v385_v8 }
  0x65   : > { %585 = vmatprep.mubr.bf16.mxu0 %v1867_v16 }
  0x6c   : > { %1621 = vmatmul.mubr.msk.bf16.gmra.mrb[24].mxu0 %vm471_vm0, %v386_v11 }
  0x6d   : > { %1095 = vmatprep.mubr.bf16.mxu0 %v1867_v16 }
  0xa7   : > { %v404_v14 = vpop.permute.xlu0 %403 }
  0xa8   : > { %v434_v12 = vpop.permute.xlu1 %433 }
  0xab   : > { %v409_v18 = vpop.permute.xlu0 %408 }
  0xac   : > { %v439_v13 = vpop.permute.xlu1 %438 }
  0xb0   : > { %v2080_v15 = vpop.permute.xlu1 %448 }
  0xb4   : > { %v414_v21 = vpop.permute.xlu1 %413 }
  0xb8   : > { %v419_v32 = vpop.permute.xlu1 %418 }
 0x10f   : > { %v527_v17 = vpop.f32.mrb[0].mxu0 }
 0x110   : > { %v529_v19 = vpop.f32.mrb[1].mxu0  ;;  %v528_v22 = vadd.f32 %v527_v17, %v404_v14 }
 0x111   : > { %v531_v20 = vpop.f32.mrb[2].mxu0  ;;  %v530_v25 = vadd.f32 %v529_v19, %v404_v14 }
 0x112   : > { %v532_v23 = vadd.f32 %v531_v20, %v409_v18  ;;  %v533_v24 = vpop.f32.mrb[3].mxu0 }
 0x113   : > { %v534_v26 = vadd.f32 %v533_v24, %v409_v18  ;;  %v444_v18 = vpop.permute.xlu0 %443 }
 0x114   : > { %v596_v27 = vmax.f32 %v528_v22, %v532_v23 }
 0x115   : > { %v603_v28 = vmax.f32 %v530_v25, %v534_v26 }
 0x116   : > { %v597_v29 = vrot.slane %v596_v27, 4 }
 0x117   : > { %v604_v30 = vrot.slane %v603_v28, 4  ;;  %v537_v31 = vpop.f32.mrb[4].mxu0 }
 0x118   : > { %v598_v33 = vmax.f32 %v596_v27, %v597_v29  ;;  %v539_v34 = vpop.f32.mrb[5].mxu0  ;;  %v2082_v35 = vadd.f32 %v537_v31, %v414_v21 }
 0x119   : > { %v605_v36 = vmax.f32 %v603_v28, %v604_v30  ;;  %v541_v37 = vpop.f32.mrb[6].mxu0  ;;  %v2084_v38 = vadd.f32 %v539_v34, %v414_v21 }
 0x11a   : > { %v599_v39 = vrot.slane %v598_v33, 2  ;;  %v543_v40 = vpop.f32.mrb[7].mxu0  ;;  %v2086_v41 = vadd.f32 %v541_v37, %v419_v32 }
 0x11b   : > { %v606_v42 = vrot.slane %v605_v36, 2  ;;  %v2088_v43 = vadd.f32 %v543_v40, %v419_v32 }
 0x11c   : > { %v600_v44 = vmax.f32 %v598_v33, %v599_v39  ;;  %v664_v45 = vpack.c.bf16 %v2086_v41, %v2082_v35 }
 0x11d   : > { %v607_v46 = vmax.f32 %v605_v36, %v606_v42  ;;  %v665_v47 = vpack.c.bf16 %v2088_v43, %v2084_v38 }
 0x11e   : > { %v601_v48 = vrot.slane %v600_v44, 1 }
 0x11f   : > { %v608_v49 = vrot.slane %v607_v46, 1  ;;  %v2094_v50 = vpop.f32.mrb[8].mxu0 }
 0x120   : > { %v602_v51 = vmax.f32 %v600_v44, %v601_v48  ;;  %v2096_v52 = vpop.f32.mrb[9].mxu0  ;;  %v640_v44 = vlaneseq }
 0x121   : > { %v609_v53 = vmax.f32 %v607_v46, %v608_v49  ;;  %v2098_v54 = vpop.f32.mrb[10].mxu0 }
 0x122   : > { %v610_v55 = vsub.f32 %v528_v22, %v602_v51  ;;  %v612_v56 = vsub.f32 %v532_v23, %v602_v51  ;;  %v2100_v57 = vpop.f32.mrb[11].mxu0  ;;  %v641_v46 = vshrl.u32 %v640_v44, 7 }
 0x123   : > { %v611_v58 = vsub.f32 %v530_v25, %v609_v53  ;;  %v613_v59 = vsub.f32 %v534_v26, %v609_v53 }
 0x124   : > { %v614_v60 = vmul.f32 1.442695, %v610_v55  ;;  %v618_v61 = vmul.f32 1.442695, %v612_v56  ;;  %v642_v48 = vsub.s32 1, %v641_v46 }
 0x125   : > { %v616_v62 = vmul.f32 1.442695, %v611_v58  ;;  %v620_v63 = vmul.f32 1.442695, %v613_v59 }
 0x126   : > { %1767 = vpow2.f32 %v614_v60 }
 0x127   : > { %1769 = vpow2.f32 %v618_v61  ;;  %v557_v0 = vpop.f32.mrb[12].mxu0 }
 0x128   : > { %1771 = vpow2.f32 %v616_v62  ;;  %v2102_v1 = vadd.f32 %v557_v0, %v434_v12  ;;  %v559_v2 = vpop.f32.mrb[13].mxu0 }
 0x129   : > { %1773 = vpow2.f32 %v620_v63  ;;  %v560_v3 = vadd.f32 %v559_v2, %v434_v12  ;;  %v561_v4 = vpop.f32.mrb[14].mxu0 }
 0x12a   : > { %v562_v5 = vadd.f32 %v561_v4, %v439_v13  ;;  %v563_v6 = vpop.f32.mrb[15].mxu0 }
 0x12b   : > { %v564_v7 = vadd.f32 %v563_v6, %v439_v13 }
 0x12c   : > { %v660_v8 = vpack.c.bf16 %v562_v5, %v2102_v1 }
 0x12d   : > { %v661_v9 = vpack.c.bf16 %v564_v7, %v560_v3 }
 0x12f   : > { %v567_v10 = vpop.f32.mrb[16].mxu0  ;;  %773 = vmatprep.subr.bf16.mxu1 %v661_v9 }
 0x130   : > { %v1768_v11 = vpop.eup %1767  ;;  %v569_v14 = vpop.f32.mrb[17].mxu0  ;;  %v2105_v22 = vadd.f32 %v567_v10, %v444_v18 }
 0x131   : > { %v1770_v17 = vpop.eup %1769  ;;  %v571_v19 = vpop.f32.mrb[18].mxu0  ;;  %v2110_v13 = vadd.f32 %v569_v14, %v444_v18 }
 0x132   : > { %v1772_v20 = vpop.eup %1771  ;;  %v622_v21 = vadd.f32 %v1770_v17, %v1768_v11  ;;  %v2108_v12 = vadd.f32 %v571_v19, %v2080_v15  ;;  %v573_v23 = vpop.f32.mrb[19].mxu0 }
 0x133   : > { %v1774_v24 = vpop.eup %1773  ;;  %v2113_v25 = vadd.f32 %v573_v23, %v2080_v15 }
 0x134   : > { %v623_v26 = vrot.slane %v622_v21, 4  ;;  %v629_v27 = vadd.f32 %v1774_v24, %v1772_v20  ;;  %v662_v28 = vpack.c.bf16 %v2108_v12, %v2105_v22  ;;  %v400_v24 = vld [vmem:[%s2348_s3 + $0x68] sm:$0xff] }
 0x135   : > { %v663_v29 = vpack.c.bf16 %v2113_v25, %v2110_v13 }
 0x136   : > { %v624_v30 = vadd.f32 %v623_v26, %v622_v21  ;;  %v630_v31 = vrot.slane %v629_v27, 4 }
 0x138   : > { %v625_v32 = vrot.slane %v624_v30, 2  ;;  %v631_v33 = vadd.f32 %v630_v31, %v629_v27  ;;  %v392_v27 = vld [vmem:[%s2348_s3 + $0x28] sm:$0xff] }
 0x13a   : > { %v626_v34 = vadd.f32 %v625_v32, %v624_v30  ;;  %v632_v36 = vrot.slane %v631_v33, 2  ;;  %v398_v32 = vld [vmem:[%s2348_s3 + $0x58] sm:$0xff] }
 0x13c   : > { %v627_v37 = vrot.slane %v626_v34, 1  ;;  %v633_v39 = vadd.f32 %v632_v36, %v631_v33  ;;  %v399_v33 = vld [vmem:[%s2348_s3 + $0x60] sm:$0xff] }
 0x13e   : > { %v628_v40 = vadd.f32 %v627_v37, %v626_v34  ;;  %v634_v42 = vrot.slane %v633_v39, 1  ;;  %v397_v34 = vld [vmem:[%s2348_s3 + $0x50] sm:$0xff] }
 0x140   : > { %1775 = vrcp.f32 %v628_v40  ;;  %v635_v15 = vadd.f32 %v634_v42, %v633_v39 }
 0x142   : > { %1777 = vrcp.f32 %v635_v15 }
 0x14a   : > { %v1776_v49 = vpop.eup %1775 }
 0x14b   : > { %v638_v51 = vmul.f32 %v1776_v49, %v1768_v11 }
 0x14c   : > { %v1778_v53 = vpop.eup %1777 }
 0x14d   : > { %v643_v55 = vrot.slane %v638_v51, %v642_v48  ;;  %v639_v56 = vmul.f32 %v1778_v53, %v1772_v20 }
 0x14f   : > { %v648_v58 = vmul.f32 %v643_v55, %v2102_v1  ;;  %v650_v59 = vmul.f32 %v643_v55, %v562_v5  ;;  %v652_v60 = vmul.f32 %v643_v55, %v2105_v22  ;;  %v647_v61 = vrot.slane %v639_v56, %v642_v48  ;;  %v2125_v1 = vpop.f32.mrb[24].mxu0 }
 0x150   : > { %v654_v62 = vmul.f32 %v643_v55, %v2108_v12  ;;  %v2133_v26 = vpop.f32.mrb[25].mxu0 }
 0x151   : > { %v653_v63 = vmul.f32 %v647_v61, %v2110_v13  ;;  %v655_v0 = vmul.f32 %v647_v61, %v2113_v25  ;;  %v649_v2 = vmul.f32 %v647_v61, %v560_v3  ;;  %v651_v4 = vmul.f32 %v647_v61, %v564_v7  ;;  %v2138_v30 = vpop.f32.mrb[26].mxu0 }
 0x152   : > { %v656_v6 = vpack.c.bf16 %v650_v59, %v648_v58  ;;  %v658_v9 = vpack.c.bf16 %v654_v62, %v652_v60  ;;  %v2140_v31 = vpop.f32.mrb[27].mxu0 }
 0x153   : > { %v657_v10 = vpack.c.bf16 %v651_v4, %v649_v2  ;;  %v659_v11 = vpack.c.bf16 %v655_v0, %v653_v63 }
 0x155   : > { %734 = vmatprep.mubr.bf16.mxu1 %v657_v10 }
 0x156   : > { %735 = vmatmul.mubr.bf16.vlgmr.msra.gmra.mrb[0].mxu1 %v656_v6 }
 0x157   : > { %774 = vmatpush1.bf16.msra.mxu1 %v660_v8  ;;  %742 = vmatprep.mubr.bf16.mxu1 %v659_v11  ;;  %v391_v8 = vld [vmem:[%s2348_s3 + $0x20] sm:$0xff] }
 0x15e   : > { %743 = vmatmul.mubr.bf16.gmra.mrb[4].mxu1 %v658_v9 }
 0x15f   : > { %805 = vmatprep.mubr.bf16.mxu1 %v1867_v16 }
 0x229   : > { %v736_v5 = vpop.f32.mrb[0].mxu1 }
 0x22a   : > { %v738_v14 = vpop.f32.mrb[1].mxu1 }
 0x22b   : > { %v739_v17 = vpop.f32.mrb[2].mxu1 }
 0x22c   : > { %v751_v18 = vpack.c.bf16 %v739_v17, %v736_v5  ;;  %v741_v19 = vpop.f32.mrb[3].mxu1 }
 0x22e   : > { %753 = vxpose.xlu0.c.b16.start.end [1/1] (short) (narrow) %v751_v18, 16 }
 0x231   : > { %v744_v3 = vpop.f32.mrb[4].mxu1 }
 0x232   : > { %v746_v7 = vpop.f32.mrb[5].mxu1 }
 0x233   : > { %v747_v20 = vpop.f32.mrb[6].mxu1 }
 0x234   : > { %v752_v21 = vpack.c.bf16 %v747_v20, %v744_v3  ;;  %v749_v23 = vpop.f32.mrb[7].mxu1 }
 0x236   : > { %1124 = vxpose.xlu1.c.b16.start.end [1/1] (short) (narrow) %v752_v21, 16 }
 0x237   : > { %423 = vperm.xlu0 %1765, %v391_v8  }
 0x23a   : > { %468 = vperm.xlu1 %1766, %v400_v24  }
 0x23b   : > { %428 = vperm.xlu0 %1765, %v392_v27  }
 0x23e   : > { %458 = vperm.xlu1 %1766, %v398_v32  }
 0x23f   : > { %463 = vperm.xlu0 %1765, %v399_v33  }
 0x243   : > { %453 = vperm.xlu0 %1765, %v397_v34  }
 0x294   : > { %v761_v36 = vpop.trf.xlu0 }
 0x295   : > { %1622 = vmatmul.mubr.msk.bf16.vlgmr.msra.gmra.mrb[8].mxu1 %vm769_vm1, %v761_v36 }
 0x296   : > { %896 = vmatprep.mubr.bf16.mxu1 %v665_v47 }
 0x29c   : > { %v1132_v13 = vpop.trf.xlu1 }
 0x2b6   : > { %v424_v37 = vpop.permute.xlu0 %423 }
 0x2b7   : > { %v2156_v39 = vadd.f32 %v2094_v50, %v424_v37  ;;  %v2159_v42 = vadd.f32 %v2096_v52, %v424_v37 }
 0x2ba   : > { %v429_v40 = vpop.permute.xlu0 %428 }
 0x2bb   : > { %v2162_v15 = vadd.f32 %v2098_v54, %v429_v40  ;;  %v2165_v44 = vadd.f32 %v2100_v57, %v429_v40 }
 0x2bd   : > { %v666_v46 = vpack.c.bf16 %v2162_v15, %v2156_v39  ;;  %v667_v38 = vpack.c.bf16 %v2165_v44, %v2159_v42 }
 0x2be   : > { %v464_v25 = vpop.permute.xlu0 %463 }
 0x2bf   : > { %v590_v22 = vadd.f32 %v2133_v26, %v464_v25 }
 0x368   : > { %v807_v43 = vpop.f32.mrb[8].mxu1 }
 0x369   : > { %v809_v47 = vpop.f32.mrb[9].mxu1 }
 0x36a   : > { %v811_v50 = vpop.f32.mrb[10].mxu1 }
 0x36b   : > { %v816_v48 = vmax.f32 %v807_v43, %v811_v50  ;;  %v813_v49 = vpop.f32.mrb[11].mxu1 }
 0x36c   : > { %v823_v51 = vmax.f32 %v809_v47, %v813_v49 }
 0x36d   : > { %v817_v52 = vrot.slane %v816_v48, 4 }
 0x36e   : > { %v824_v53 = vrot.slane %v823_v51, 4 }
 0x36f   : > { %v818_v55 = vmax.f32 %v816_v48, %v817_v52 }
 0x370   : > { %v825_v54 = vmax.f32 %v823_v51, %v824_v53 }
 0x371   : > { %v819_v56 = vrot.slane %v818_v55, 2 }
 0x372   : > { %v826_v58 = vrot.slane %v825_v54, 2 }
 0x373   : > { %v820_v57 = vmax.f32 %v818_v55, %v819_v56  ;;  %v674_v55 = vld [vmem:[%s2349_s4] sm:$0xff] }
 0x374   : > { %v827_v59 = vmax.f32 %v825_v54, %v826_v58  ;;  %v675_v54 = vld [vmem:[%s2349_s4 + $0x8] sm:$0xff]  ;;  %v1868_v58 = vmov 0.0  }
 0x375   : > { %v821_v60 = vrot.slane %v820_v57, 1  ;;  %v694_v56 = vpack.c.bf16 %v675_v54, %v674_v55 }
 0x376   : > { %v828_v61 = vrot.slane %v827_v59, 1 }
 0x377   : > { %v822_v62 = vmax.f32 %v820_v57, %v821_v60 }
 0x378   : > { %v829_v63 = vmax.f32 %v827_v59, %v828_v61 }
 0x379   : > { %v830_v0 = vsub.f32 %v807_v43, %v822_v62  ;;  %v832_v2 = vsub.f32 %v811_v50, %v822_v62 }
 0x37a   : > { %v831_v4 = vsub.f32 %v809_v47, %v829_v63  ;;  %v833_v6 = vsub.f32 %v813_v49, %v829_v63 }
 0x37b   : > { %v834_v9 = vmul.f32 1.442695, %v830_v0  ;;  %v838_v10 = vmul.f32 1.442695, %v832_v2 }
 0x37c   : > { %v836_v11 = vmul.f32 1.442695, %v831_v4  ;;  %v840_v5 = vmul.f32 1.442695, %v833_v6  ;;  %v676_v4 = vld [vmem:[%s2349_s4 + $0x10] sm:$0xff]  ;;  %v677_v6 = vld [vmem:[%s2349_s4 + $0x18] sm:$0xff] }
 0x37d   : > { %1779 = vpow2.f32 %v834_v9 }
 0x37e   : > { %1781 = vpow2.f32 %v838_v10  ;;  %v695_v10 = vpack.c.bf16 %v677_v6, %v676_v4 }
 0x37f   : > { %1783 = vpow2.f32 %v836_v11  ;;  %v686_v11 = vld [vmem:[%s2349_s4 + $0x60] sm:$0xff] }
 0x380   : > { %1785 = vpow2.f32 %v840_v5  ;;  %v687_v5 = vld [vmem:[%s2349_s4 + $0x68] sm:$0xff] }
 0x387   : > { %v1780_v14 = vpop.eup %1779 }
 0x388   : > { %v1782_v17 = vpop.eup %1781 }
 0x389   : > { %v1784_v18 = vpop.eup %1783  ;;  %v842_v19 = vadd.f32 %v1782_v17, %v1780_v14 }
 0x38a   : > { %v1786_v3 = vpop.eup %1785 }
 0x38b   : > { %v843_v7 = vrot.slane %v842_v19, 4  ;;  %v849_v20 = vadd.f32 %v1786_v3, %v1784_v18 }
 0x38d   : > { %v844_v21 = vadd.f32 %v843_v7, %v842_v19  ;;  %v850_v23 = vrot.slane %v849_v20, 4  ;;  %v679_v19 = vld [vmem:[%s2349_s4 + $0x28] sm:$0xff] }
 0x38f   : > { %v845_v8 = vrot.slane %v844_v21, 2  ;;  %v851_v24 = vadd.f32 %v850_v23, %v849_v20 }
 0x391   : > { %v846_v27 = vadd.f32 %v845_v8, %v844_v21  ;;  %v852_v32 = vrot.slane %v851_v24, 2 }
 0x393   : > { %v847_v33 = vrot.slane %v846_v27, 1  ;;  %v853_v34 = vadd.f32 %v852_v32, %v851_v24  ;;  %v689_v32 = vld [vmem:[%s2349_s4 + $0x78] sm:$0xff] }
 0x395   : > { %v848_v36 = vadd.f32 %v847_v33, %v846_v27  ;;  %v854_v37 = vrot.slane %v853_v34, 1  ;;  %v688_v27 = vld [vmem:[%s2349_s4 + $0x70] sm:$0xff] }
 0x397   : > { %1787 = vrcp.f32 %v848_v36  ;;  %v855_v40 = vadd.f32 %v854_v37, %v853_v34  ;;  %v697_v34 = vpack.c.bf16 %v689_v32, %v688_v27 }
 0x399   : > { %1789 = vrcp.f32 %v855_v40 }
 0x3a1   : > { %v1788_v43 = vpop.eup %1787 }
 0x3a2   : > { %v858_v47 = vmul.f32 %v1788_v43, %v1780_v14  ;;  %v860_v50 = vmul.f32 %v1788_v43, %v1782_v17  ;;  %v696_v14 = vpack.c.bf16 %v687_v5, %v686_v11  ;;  %v678_v17 = vld [vmem:[%s2349_s4 + $0x20] sm:$0xff] }
 0x3a3   : > { %v1790_v48 = vpop.eup %1789 }
 0x3a4   : > { %v859_v49 = vmul.f32 %v1790_v48, %v1784_v18  ;;  %v861_v51 = vmul.f32 %v1790_v48, %v1786_v3  ;;  %v862_v52 = vpack.c.bf16 %v860_v50, %v858_v47  ;;  %v588_v48 = vadd.f32 %v2125_v1, %v464_v25 }
 0x3a6   : > { %v863_v53 = vpack.c.bf16 %v861_v51, %v859_v49 }
 0x3a8   : > { %864 = vmatprep.subr.bf16.mxu1 %v863_v53  ;;  %1063 = vmatprep.subr.bf16.mxu0 %v863_v53 }
 0x3a9   : > { %865 = vmatpush1.bf16.xpose.msra.mxu1 %v862_v52  ;;  %1064 = vmatpush1.bf16.msra.mxu0 %v862_v52 }
 0x3aa   : > { %1658 = vmatprep.subr.bf16.mxu1 %v1868_v58  ;;  %1682 = vmatprep.subr.bf16.mxu0 %v1868_v58 }
 0x3b0   : > { %897 = vmatmul.mubr.bf16.vlgmr.msra.gmra.mrb[12].mxu1 %v664_v45 }
 0x3b1   : > { %1659 = vmatpush3.bf16.msra.mxu1 %v694_v56  ;;  %1660 = vmatprep.mubr.msk.bf16.mxu1 %vm1869_vm2, %v1868_v58 }
 0x3b2   : > { %1664 = vmatprep.subr.bf16.mxu1 %v1868_v58 }
 0x483   : > { %v898_v35 = vpop.f32.mrb[12].mxu1 }
 0x484   : > { %v900_v41 = vpop.f32.mrb[13].mxu1 }
 0x485   : > { %v901_v45 = vpop.f32.mrb[14].mxu1 }
 0x486   : > { %v905_v57 = vpack.c.bf16 %v901_v45, %v898_v35  ;;  %v903_v59 = vpop.f32.mrb[15].mxu1 }
 0x488   : > { %1661 = vmatmul.mubr.msk.bf16.vlgmr.msra.gmra.mrb[16].mxu1 %vm769_vm1, %v905_v57 }
 0x489   : > { %1666 = vmatprep.mubr.msk.bf16.mxu1 %vm1869_vm2, %v1868_v58 }
 0x55b   : > { %v943_v60 = vpop.f32.mrb[16].mxu1 }
 0x55c   : > { %v950_v61 = vsub.f32 %v943_v60, %v898_v35  ;;  %v1662_v62 = vpop.f32.mrb[17].mxu1 }
 0x55d   : > { %v946_v63 = vpop.f32.mrb[18].mxu1 }
 0x55e   : > { %v951_v0 = vsub.f32 %v946_v63, %v901_v45  ;;  %v1663_v2 = vpop.f32.mrb[19].mxu1 }
 0x560   : > { %v952_v9 = vpack.c.bf16 %v951_v0, %v950_v61 }
 0x562   : > { %1665 = vmatpush3.bf16.msra.mxu1 %v952_v9 }
 0x565   : > { %1667 = vmatmul.mubr.msk.bf16.vlgmr.msra.gmra.mrb[20].mxu1 %vm769_vm1, %v695_v10 }
 0x566   : > { %1672 = vmatprep.mubr.msk.bf16.mxu1 %vm769_vm1, %v696_v14 }
 0x638   : > { %v990_v18 = vpop.f32.mrb[20].mxu1 }
 0x639   : > { %v991_v3 = vadd.f32 %v990_v18, %v678_v17  ;;  %v1668_v7 = vpop.f32.mrb[21].mxu1 }
 0x63a   : > { %v993_v20 = vpop.f32.mrb[22].mxu1 }
 0x63b   : > { %v994_v21 = vadd.f32 %v993_v20, %v679_v19  ;;  %v1669_v23 = vpop.f32.mrb[23].mxu1  ;;  %v997_v8 = vmax.f32 %v991_v3, 0.0 }
 0x63d   : > { %v998_v24 = vmax.f32 %v994_v21, 0.0 }
 0x63f   : > { %v999_v33 = vpack.c.bf16 %v998_v24, %v997_v8 }
 0x641   : > { %1670 = vmatprep.subr.bf16.mxu1 %v999_v33 }
 0x642   : > { %1671 = vmatpush3.bf16.msra.mxu1 %v999_v33 }
 0x643   : > { %1694 = vmatprep.subr.bf16.mxu1 %v863_v53 }
 0x645   : > { %1673 = vmatmul.mubr.msk.bf16.vlgmr.msra.gmra.mrb[24].mxu1 %vm769_vm1, %v697_v34 }
 0x646   : > { %1695 = vmatpush1.bf16.msra.mxu1 %v862_v52  ;;  %1105 = vmatprep.mubr.bf16.mxu1 %v1867_v16 }
 0x647   : > { %1143 = vmatprep.subr.bf16.mxu1 %v663_v29  ;;  %v469_v29 = vpop.permute.xlu1 %468 }
 0x648   : > { %v594_v52 = vadd.f32 %v2140_v31, %v469_v29 }
 0x718   : > { %v1674_v36 = vpop.f32.mrb[24].mxu1 }
 0x719   : > { %v1040_v37 = vpop.f32.mrb[25].mxu1 }
 0x71a   : > { %v1675_v40 = vpop.f32.mrb[26].mxu1 }
 0x71b   : > { %v1056_v43 = vpack.c.bf16 %v1675_v40, %v1674_v36  ;;  %v1043_v47 = vpop.f32.mrb[27].mxu1 }
 0x71c   : > { %v1055_v50 = vpack.c.bf16 %v1043_v47, %v1040_v37 }
 0x71d   : > { %1628 = vmatmul.mubr.msk.bf16.vlgmr.msra.gmra.mrb[28].mxu1 %vm769_vm1, %v1056_v43 }
 0x71e   : > { %1144 = vmatpush1.bf16.msra.mxu1 %v662_v28  ;;  %1627 = vmatmul.mubr.msk.bf16.vlgmr.msra.gmra.mrb[20].mxu0 %vm769_vm1, %v1055_v50  ;;  %v592_v28 = vadd.f32 %v2138_v30, %v469_v29 }
 0x71f   : > { %1175 = vmatprep.mubr.bf16.mxu1 %v1867_v16  ;;  %1684 = vmatprep.mubr.msk.bf16.mxu0 %vm1869_vm2, %v1868_v58 }
 0x725   : > { %1629 = vmatmul.mubr.msk.bf16.vlgmr.msra.gmra.mrb[32].mxu1 %vm769_vm1, %v1132_v13 }
 0x726   : > { %1266 = vmatprep.mubr.bf16.mxu1 %v667_v38 }
 0x7f0   : > { %v1107_v12 = vpop.f32.mrb[28].mxu1 }
 0x7f1   : > { %v2234_v49 = vadd.f32 %v1107_v12, %v588_v48  ;;  %v1109_v51 = vpop.f32.mrb[29].mxu1 }
 0x7f2   : > { %v2237_v53 = vadd.f32 %v1109_v51, %v590_v22  ;;  %v1111_v55 = vpop.f32.mrb[30].mxu1 }
 0x7f3   : > { %v2239_v54 = vadd.f32 %v1111_v55, %v592_v28  ;;  %v1113_v42 = vpop.f32.mrb[31].mxu1  ;;  %v681_v55 = vld [vmem:[%s2349_s4 + $0x38] sm:$0xff] }
 0x7f4   : > { %v2241_v44 = vadd.f32 %v1113_v42, %v594_v52  ;;  %v680_v52 = vld [vmem:[%s2349_s4 + $0x30] sm:$0xff] }
 0x7f5   : > { %v698_v42 = vpack.c.bf16 %v681_v55, %v680_v52 }
 0x7f8   : > { %v1177_v38 = vpop.f32.mrb[32].mxu1 }
 0x7f9   : > { %v1179_v1 = vpop.f32.mrb[33].mxu1 }
 0x7fa   : > { %v1181_v56 = vpop.f32.mrb[34].mxu1 }
 0x7fb   : > { %v1186_v26 = vmax.f32 %v1177_v38, %v1181_v56  ;;  %v1183_v35 = vpop.f32.mrb[35].mxu1 }
 0x7fc   : > { %v1193_v41 = vmax.f32 %v1179_v1, %v1183_v35 }
 0x7fd   : > { %v1187_v30 = vrot.slane %v1186_v26, 4 }
 0x7fe   : > { %v1194_v45 = vrot.slane %v1193_v41, 4 }
 0x7ff   : > { %v1188_v57 = vmax.f32 %v1186_v26, %v1187_v30 }
 0x800   : > { %v1195_v59 = vmax.f32 %v1193_v41, %v1194_v45  ;;  %v682_v45 = vld [vmem:[%s2349_s4 + $0x40] sm:$0xff] }
 0x801   : > { %v1189_v60 = vrot.slane %v1188_v57, 2 }
 0x802   : > { %v1196_v31 = vrot.slane %v1195_v59, 2 }
 0x803   : > { %v1190_v61 = vmax.f32 %v1188_v57, %v1189_v60  ;;  %v683_v57 = vld [vmem:[%s2349_s4 + $0x48] sm:$0xff] }
 0x804   : > { %v1197_v62 = vmax.f32 %v1195_v59, %v1196_v31  ;;  %v699_v60 = vpack.c.bf16 %v683_v57, %v682_v45  ;;  %v690_v31 = vld [vmem:[%s2349_s4 + $0x80] sm:$0xff] }
 0x805   : > { %v1191_v63 = vrot.slane %v1190_v61, 1 }
 0x806   : > { %v1198_v0 = vrot.slane %v1197_v62, 1 }
 0x807   : > { %v1192_v2 = vmax.f32 %v1190_v61, %v1191_v63  ;;  %v691_v61 = vld [vmem:[%s2349_s4 + $0x88] sm:$0xff]  ;;  %v684_v63 = vld [vmem:[%s2349_s4 + $0x50] sm:$0xff] }
 0x808   : > { %v1199_v4 = vmax.f32 %v1197_v62, %v1198_v0  ;;  %v700_v62 = vpack.c.bf16 %v691_v61, %v690_v31 }
 0x809   : > { %v1200_v6 = vsub.f32 %v1177_v38, %v1192_v2  ;;  %v1202_v9 = vsub.f32 %v1181_v56, %v1192_v2  ;;  %v685_v2 = vld [vmem:[%s2349_s4 + $0x58] sm:$0xff] }
 0x80a   : > { %v1201_v10 = vsub.f32 %v1179_v1, %v1199_v4  ;;  %v1203_v11 = vsub.f32 %v1183_v35, %v1199_v4 }
 0x80b   : > { %v1204_v5 = vmul.f32 1.442695, %v1200_v6  ;;  %v1208_v14 = vmul.f32 1.442695, %v1202_v9 }
 0x80c   : > { %v1206_v17 = vmul.f32 1.442695, %v1201_v10  ;;  %v1210_v18 = vmul.f32 1.442695, %v1203_v11 }
 0x80d   : > { %1791 = vpow2.f32 %v1204_v5 }
 0x80e   : > { %1793 = vpow2.f32 %v1208_v14 }
 0x80f   : > { %1795 = vpow2.f32 %v1206_v17  ;;  %v692_v17 = vld [vmem:[%s2349_s4 + $0x90] sm:$0xff] }
 0x810   : > { %1797 = vpow2.f32 %v1210_v18  ;;  %v693_v18 = vld [vmem:[%s2349_s4 + $0x98] sm:$0xff] }
 0x817   : > { %v1792_v19 = vpop.eup %1791 }
 0x818   : > { %v1794_v3 = vpop.eup %1793 }
 0x819   : > { %v1796_v7 = vpop.eup %1795  ;;  %v1212_v20 = vadd.f32 %v1794_v3, %v1792_v19 }
 0x81a   : > { %v1798_v21 = vpop.eup %1797 }
 0x81b   : > { %v1213_v23 = vrot.slane %v1212_v20, 4  ;;  %v1219_v8 = vadd.f32 %v1798_v21, %v1796_v7 }
 0x81d   : > { %v1214_v24 = vadd.f32 %v1213_v23, %v1212_v20  ;;  %v1220_v27 = vrot.slane %v1219_v8, 4 }
 0x81f   : > { %v1215_v32 = vrot.slane %v1214_v24, 2  ;;  %v1221_v33 = vadd.f32 %v1220_v27, %v1219_v8  ;;  %v454_v27 = vpop.permute.xlu0 %453 }
 0x821   : > { %v1216_v34 = vadd.f32 %v1215_v32, %v1214_v24  ;;  %v1222_v36 = vrot.slane %v1221_v33, 2 }
 0x823   : > { %v1217_v37 = vrot.slane %v1216_v34, 1  ;;  %v1223_v40 = vadd.f32 %v1222_v36, %v1221_v33  ;;  %v459_v36 = vpop.permute.xlu1 %458 }
 0x825   : > { %v1218_v43 = vadd.f32 %v1217_v37, %v1216_v34  ;;  %v1224_v47 = vrot.slane %v1223_v40, 1 }
 0x827   : > { %1799 = vrcp.f32 %v1218_v43  ;;  %v1225_v50 = vadd.f32 %v1224_v47, %v1223_v40 }
 0x829   : > { %1801 = vrcp.f32 %v1225_v50 }
 0x831   : > { %v1800_v13 = vpop.eup %1799 }
 0x832   : > { %v1228_v25 = vmul.f32 %v1800_v13, %v1792_v19  ;;  %v1230_v29 = vmul.f32 %v1800_v13, %v1794_v3  ;;  %v701_v3 = vpack.c.bf16 %v693_v18, %v692_v17 }
 0x833   : > { %v1802_v48 = vpop.eup %1801 }
 0x834   : > { %v1229_v22 = vmul.f32 %v1802_v48, %v1796_v7  ;;  %v1231_v12 = vmul.f32 %v1802_v48, %v1798_v21  ;;  %v1232_v28 = vpack.c.bf16 %v1230_v29, %v1228_v25 }
 0x836   : > { %v1233_v51 = vpack.c.bf16 %v1231_v12, %v1229_v22 }
 0x838   : > { %1234 = vmatprep.subr.bf16.mxu1 %v1233_v51 }
 0x839   : > { %1235 = vmatpush1.bf16.xpose.msra.mxu1 %v1232_v28 }
 0x83a   : > { %1676 = vmatprep.subr.bf16.mxu1 %v1868_v58 }
 0x840   : > { %1267 = vmatmul.mubr.bf16.vlgmr.msra.gmra.mrb[36].mxu1 %v666_v46 }
 0x841   : > { %1678 = vmatprep.mubr.msk.bf16.mxu1 %vm1869_vm2, %v1868_v58  ;;  %1677 = vmatpush3.bf16.msra.mxu1 %v698_v42 }
 0x913   : > { %v1268_v38 = vpop.f32.mrb[36].mxu1 }
 0x914   : > { %v1270_v1 = vpop.f32.mrb[37].mxu1 }
 0x915   : > { %v1271_v56 = vpop.f32.mrb[38].mxu1 }
 0x916   : > { %v1275_v26 = vpack.c.bf16 %v1271_v56, %v1268_v38  ;;  %v1273_v35 = vpop.f32.mrb[39].mxu1 }
 0x918   : > { %1679 = vmatmul.mubr.msk.bf16.vlgmr.msra.gmra.mrb[40].mxu1 %vm769_vm1, %v1275_v26 }
 0x919   : > { %1690 = vmatprep.mubr.msk.bf16.mxu1 %vm769_vm1, %v700_v62 }
 0x9eb   : > { %v1313_v39 = vpop.f32.mrb[40].mxu1 }
 0x9ec   : > { %v1320_v15 = vsub.f32 %v1313_v39, %v1268_v38  ;;  %v1680_v46 = vpop.f32.mrb[41].mxu1 }
 0x9ed   : > { %v1316_v58 = vpop.f32.mrb[42].mxu1 }
 0x9ee   : > { %v1321_v41 = vsub.f32 %v1316_v58, %v1271_v56  ;;  %v1681_v30 = vpop.f32.mrb[43].mxu1 }
 0x9f0   : > { %v1322_v59 = vpack.c.bf16 %v1321_v41, %v1320_v15 }
 0x9f2   : > { %1683 = vmatpush3.bf16.msra.mxu0 %v1322_v59 }
 0x9f3   : > { %1433 = vmatprep.subr.bf16.mxu0 %v1233_v51 }
 0x9f5   : > { %1685 = vmatmul.mubr.msk.bf16.vlgmr.msra.gmra.mrb[28].mxu0 %vm769_vm1, %v699_v60 }
 0x9f6   : > { %1434 = vmatpush1.bf16.msra.mxu0 %v1232_v28  ;;  %1465 = vmatprep.mubr.bf16.mxu0 %v1867_v16 }
 0xac8   : > { %v1360_v0 = vpop.f32.mrb[28].mxu0 }
 0xac9   : > { %v1361_v4 = vadd.f32 %v1360_v0, %v684_v63  ;;  %v1686_v6 = vpop.f32.mrb[29].mxu0 }
 0xaca   : > { %v1363_v9 = vpop.f32.mrb[30].mxu0 }
 0xacb   : > { %v1364_v10 = vadd.f32 %v1363_v9, %v685_v2  ;;  %v1687_v11 = vpop.f32.mrb[31].mxu0  ;;  %v1367_v5 = vmax.f32 %v1361_v4, 0.0 }
 0xacd   : > { %v1368_v14 = vmax.f32 %v1364_v10, 0.0 }
 0xacf   : > { %v1369_v19 = vpack.c.bf16 %v1368_v14, %v1367_v5 }
 0xad1   : > { %1688 = vmatprep.subr.bf16.mxu1 %v1369_v19 }
 0xad2   : > { %1689 = vmatpush3.bf16.msra.mxu1 %v1369_v19 }
 0xad5   : > { %1691 = vmatmul.mubr.msk.bf16.vlgmr.msra.gmra.mrb[44].mxu1 %vm769_vm1, %v701_v3 }
 0xba8   : > { %v1692_v7 = vpop.f32.mrb[44].mxu1 }
 0xba9   : > { %v1410_v20 = vpop.f32.mrb[45].mxu1 }
 0xbaa   : > { %v1693_v21 = vpop.f32.mrb[46].mxu1 }
 0xbab   : > { %v1426_v23 = vpack.c.bf16 %v1693_v21, %v1692_v7  ;;  %v1413_v8 = vpop.f32.mrb[47].mxu1 }
 0xbac   : > { %v1425_v24 = vpack.c.bf16 %v1413_v8, %v1410_v20 }
 0xbae   : > { %1634 = vmatmul.mubr.msk.bf16.vlgmr.msra.gmra.mrb[20].mxu0 %vm769_vm1, %v1425_v24 }
 0xbaf   : > { %1475 = vmatprep.mubr.bf16.mxu0 %v1867_v16 }
 0xbb6   : > { %1635 = vmatmul.mubr.msk.bf16.gmra.mrb[32].mxu0 %vm769_vm1, %v1426_v23 }
 0xc81   : > { %v1467_v32 = vpop.f32.mrb[20].mxu0 }
 0xc82   : > { %v1696_v33 = vadd.f32 %v1467_v32, %v454_v27  ;;  %v1469_v34 = vpop.f32.mrb[21].mxu0 }
 0xc83   : > { %v1697_v37 = vadd.f32 %v1469_v34, %v454_v27  ;;  %v1471_v40 = vpop.f32.mrb[22].mxu0 }
 0xc84   : > { %1494 = vst [vmem:[%s337_s14] sm:$0xff] %v1696_v33  ;;  %v1698_v43 = vadd.f32 %v1471_v40, %v459_v36  ;;  %v1473_v47 = vpop.f32.mrb[23].mxu0 }
 0xc85   : > { %1495 = vst [vmem:[%s337_s14 + $0x8] sm:$0xff] %v1697_v37  ;;  %v1699_v50 = vadd.f32 %v1473_v47, %v459_v36 }
 0xc86   : > { %1496 = vst [vmem:[%s337_s14 + $0x10] sm:$0xff] %v1698_v43 }
 0xc87   : > { %1497 = vst [vmem:[%s337_s14 + $0x18] sm:$0xff] %v1699_v50 }
 0xc89   : > { %v1477_v16 = vpop.f32.mrb[32].mxu0 }
 0xc8a   : > { %v1490_v13 = vadd.f32 %v1477_v16, %v2234_v49  ;;  %v1479_v25 = vpop.f32.mrb[33].mxu0 }
 0xc8b   : > { %v1491_v29 = vadd.f32 %v1479_v25, %v2237_v53  ;;  %v1481_v48 = vpop.f32.mrb[34].mxu0 }
 0xc8c   : > { %1498 = vst [vmem:[%s337_s14 + $0x20] sm:$0xff] %v1490_v13  ;;  %v1492_v22 = vadd.f32 %v1481_v48, %v2239_v54  ;;  %v1483_v12 = vpop.f32.mrb[35].mxu0 }
 0xc8d   : > { %1499 = vst [vmem:[%s337_s14 + $0x28] sm:$0xff] %v1491_v29  ;;  %v1493_v49 = vadd.f32 %v1483_v12, %v2241_v44 }
 0xc8e   : > { %1500 = vst [vmem:[%s337_s14 + $0x30] sm:$0xff] %v1492_v22 }
 0xc8f   : > { %1501 = vst [vmem:[%s337_s14 + $0x38] sm:$0xff] %v1493_v49 }
 0xc90   : > { %1816 = shalt.err (!%p1813_p5)
}
 0xc91   : > { %s1817_s7 = scalar_lea.hbm %s2298_s25, 1024  ;;  %s1821_s11 = scalar_lea.hbm %s2351_s6, 2048 }
 0xc92   : > { %p1818_p7 = scmp.ne.s32.totalorder %s2298_s25, %s1817_s7  ;;  %p1822_p12 = scmp.lt.u32.totalorder %s2298_s25, %s2351_s6 }
 0xc93   : > { %p1823_p13 = scmp.lt.u32.totalorder %s1821_s11, %s1817_s7  ;;  %p1825_p1 = scmp.lt.u32.totalorder %s1817_s7, %s2298_s25 }
 0xc94   : > { %p1819_p10 = pnand %p1818_p7, %p1951_p6 }
 0xc95   : > { %p1824_p0 = por %p1823_p13, %p1822_p12 }
 0xc96   : > { %p1820_p11 = pneg %p1819_p10 }
 0xc97   : > { %p1826_p2 = por %p1825_p1, %p1824_p0 }
 0xc99   : > { %p1827_p3 = pnand %p1826_p2, %p1820_p11 }
 0xc9b   : > { %1830 = shalt.err (!%p1827_p3)
}
 0xc9c   : > { %s1871_s16 = smov 256   ;;  %s1872_s10 = smov 512  }
 0xc9d   : > { %s1873_s12 = smov 16  }
 0xc9e   : > { %1720 = dma.vmem_to_hbm [thread:$0]  (%p1951_p6), %s2291_s15, 1024, %s2298_s25, %s2303_s17, %s1871_s16, %s1872_s10, %s1873_s12  }
 0xc9f PF: > { %s1531_s18 = sand.u32 1, %s1853_s21   ;;  %p1723_p4 = pnand %p1604_p9, %p1955_p8 }
 0xca0   : > { %s1532_s19 = scalar_lea.sflag [#allocation5], %s1531_s18 }
 0xca1   : > { %1848 = dma.done.wait (!%p1723_p4), %s1532_s19, 1024  }
 0xca2   : > { %1850 = vsyncadd (!%p1723_p4), %s1532_s19, 4294966272  ;;  %p16_p5 = scmp.ge.s32.totalorder %s1932_s27, 4   ;;  %s2355_s21 = smov %s1857_s22 }
 0xca3   : > { %s2356_s22 = smov %s1861_s23  ;;  %s2357_s23 = smov %s1945_s30 }
 0xca4   : > { %s2358_s24 = smov %s1932_s27  ;;  %18 = sbr.rel (!%p16_p5) target bundleno = 3 (0x3), region = 138 }
 0xcab   :  { %1537 = vsyncpa [#allocation5], 1 }
 0xcac   :  { %1539 = vsyncpa [#allocation5 + $0x1], 1 }

</bundles_post_ra>
